<compile_context>
chip_gen: v7x
topology: tpu7x:2x2x1
jax: 0.10.0
libtpu: 0.0.40
codegen_flags: <defaults>
</compile_context>

<pallas_src>
import functools

import jax
import jax.numpy as jnp
from jax.experimental import pallas as pl
from jax.experimental.pallas import tpu as pltpu


def _round_up(x, m):
    return ((x + m - 1) // m) * m


def lstm_fc_kernel(x_ref, wih_ref, whh_ref, b_ref, wfc_ref, bfc_ref,
                   out_ref, xp_ref, *, S, Bp, Hp):
    """Fused LSTM recurrence + final linear layer (single grid point).

    x_ref   : (S*Bp, Ep)  bf16  embedded inputs, time-major rows (t*Bp + b)
    wih_ref : (Ep, 4Hp)   bf16  input->gates weights (transposed, per-gate padded)
    whh_ref : (Hp, 4Hp)   bf16  hidden->gates weights (transposed, per-gate padded)
    b_ref   : (1, 4Hp)    f32   b_ih + b_hh (per-gate padded)
    wfc_ref : (Hp, Vp)    bf16  fc weights (transposed, padded)
    bfc_ref : (1, Vp)     f32   fc bias (padded)
    out_ref : (Bp, Vp)    f32   logits for the last timestep
    xp_ref  : (S*Bp, 4Hp) f32   VMEM scratch for the hoisted input projection
    """
    # ---- hoisted input projection: one big MXU matmul for all timesteps ----
    xp_ref[...] = (
        jnp.dot(x_ref[...], wih_ref[...], preferred_element_type=jnp.float32)
        + b_ref[...]
    )

    # ---- recurrence: h/c live in vregs; exactly one matmul per step on the
    #      serial critical path.  S is small & static -> fully unrolled so the
    #      LLO scheduler sees the whole chain. ----
    h = jnp.zeros((Bp, Hp), jnp.float32)
    c = jnp.zeros((Bp, Hp), jnp.float32)

    for t in range(S):
        gates = xp_ref[t * Bp:(t + 1) * Bp, :] + jnp.dot(
            h.astype(jnp.bfloat16), whh_ref[...],
            preferred_element_type=jnp.float32)          # (Bp, 4Hp) f32
        # Gate slices fall exactly on 128-lane vreg boundaries (free slicing).
        i = jax.nn.sigmoid(gates[:, 0 * Hp:1 * Hp])
        f = jax.nn.sigmoid(gates[:, 1 * Hp:2 * Hp])
        g = jnp.tanh(gates[:, 2 * Hp:3 * Hp])
        o = jax.nn.sigmoid(gates[:, 3 * Hp:4 * Hp])
        c = f * c + i * g
        h = o * jnp.tanh(c)

    # ---- fc on the last hidden state (lane-dense output store) ----
    out_ref[...] = (
        jnp.dot(h.astype(jnp.bfloat16), wfc_ref[...],
                preferred_element_type=jnp.float32)
        + bfc_ref[...]
    )


def fast_weights_forward(tokens, params):
    """tokens: (B, S) int32.  Returns (B, vocab) float32 logits."""
    emb = params["embedding"]          # (vocab, E)
    w_ih_t = params["w_ih_t"]          # (E, 4H)   columns ordered [i|f|g|o]
    w_hh_t = params["w_hh_t"]          # (H, 4H)
    b = params["b"]                    # (1, 4H)   (b_ih + b_hh)
    w_fc_t = params["w_fc_t"]          # (H, V)
    b_fc = params["b_fc"]              # (1, V)

    B, S = tokens.shape
    E = emb.shape[1]
    H = w_hh_t.shape[0]
    V = w_fc_t.shape[1]

    Bp = _round_up(B, 8)               # sublane multiple
    Ep = _round_up(E, 128)             # lane multiples
    Hp = _round_up(H, 128)
    Vp = _round_up(V, 128)

    # ---- pad params into tile-aligned, bf16 MXU-friendly layouts ----
    emb_p = jnp.zeros((emb.shape[0], Ep), jnp.float32).at[:, :E].set(emb)

    def pad_gates(w, rows_real, rows_pad):
        # w: (rows_real, 4H) with gate blocks [i|f|g|o] -> (rows_pad, 4Hp)
        out = jnp.zeros((rows_pad, 4 * Hp), w.dtype)
        for k in range(4):
            out = out.at[:rows_real, k * Hp:k * Hp + H].set(
                w[:, k * H:(k + 1) * H])
        return out

    wih_p = pad_gates(w_ih_t, E, Ep).astype(jnp.bfloat16)
    whh_p = pad_gates(w_hh_t, H, Hp).astype(jnp.bfloat16)
    b_p = pad_gates(b, 1, 1).astype(jnp.float32)
    wfc_p = (jnp.zeros((Hp, Vp), jnp.float32).at[:H, :V].set(w_fc_t)
             .astype(jnp.bfloat16))
    bfc_p = jnp.zeros((1, Vp), jnp.float32).at[:, :V].set(b_fc)

    # ---- embedding gather, time-major without transposing activations ----
    tok_p = jnp.zeros((Bp, S), tokens.dtype).at[:B, :].set(tokens)
    x_tm = jnp.take(emb_p, tok_p.T, axis=0)              # (S, Bp, Ep)
    x2d = x_tm.reshape(S * Bp, Ep).astype(jnp.bfloat16)  # row = t*Bp + b

    kernel = functools.partial(lstm_fc_kernel, S=S, Bp=Bp, Hp=Hp)
    vmem = pl.BlockSpec(memory_space=pltpu.MemorySpace.VMEM)
    out_p = pl.pallas_call(
        kernel,
        out_shape=jax.ShapeDtypeStruct((Bp, Vp), jnp.float32),
        in_specs=[vmem] * 6,
        out_specs=vmem,
        scratch_shapes=[
            pltpu.VMEM((S * Bp, 4 * Hp), jnp.float32),  # hoisted x-projection
        ],
    )(x2d, wih_p, whh_p, b_p, wfc_p, bfc_p)

    return out_p[:B, :V]


def init_params(key, vocab_size, embed_dim, hidden_dim):
    ks = jax.random.split(key, 7)
    scale = 0.1
    embedding = scale * jax.random.normal(ks[0], (vocab_size, embed_dim), jnp.float32)
    # PyTorch stores W_ih: (4H, E), W_hh: (4H, H); we keep them pre-transposed.
    w_ih_t = scale * jax.random.normal(ks[1], (embed_dim, 4 * hidden_dim), jnp.float32)
    w_hh_t = scale * jax.random.normal(ks[2], (hidden_dim, 4 * hidden_dim), jnp.float32)
    b_ih = scale * jax.random.normal(ks[3], (4 * hidden_dim,), jnp.float32)
    b_hh = scale * jax.random.normal(ks[4], (4 * hidden_dim,), jnp.float32)
    w_fc_t = scale * jax.random.normal(ks[5], (hidden_dim, vocab_size), jnp.float32)
    b_fc = scale * jax.random.normal(ks[6], (vocab_size,), jnp.float32)
    return {
        "embedding": embedding,
        "w_ih_t": w_ih_t,
        "w_hh_t": w_hh_t,
        "b": (b_ih + b_hh).reshape(1, -1),
        "w_fc_t": w_fc_t,
        "b_fc": b_fc.reshape(1, -1),
    }


def reference_forward(tokens, params):
    """Pure-JAX f32 reference with PyTorch-identical semantics."""
    emb = jnp.take(params["embedding"], tokens, axis=0)  # (B, S, E)
    B, S, E = emb.shape
    H = params["w_hh_t"].shape[0]
    h = jnp.zeros((B, H), jnp.float32)
    c = jnp.zeros((B, H), jnp.float32)
    for t in range(S):
        gates = emb[:, t, :] @ params["w_ih_t"] + h @ params["w_hh_t"] + params["b"]
        i = jax.nn.sigmoid(gates[:, 0:H])
        f = jax.nn.sigmoid(gates[:, H:2 * H])
        g = jnp.tanh(gates[:, 2 * H:3 * H])
        o = jax.nn.sigmoid(gates[:, 3 * H:4 * H])
        c = f * c + i * g
        h = o * jnp.tanh(c)
    return h @ params["w_fc_t"] + params["b_fc"]


if __name__ == "__main__":
    vocab_size, embed_dim, hidden_dim, seq_length = 16, 16, 32, 8
    batch = 2

    key = jax.random.PRNGKey(0)
    k_tok, k_par = jax.random.split(key)
    params = init_params(k_par, vocab_size, embed_dim, hidden_dim)
    tokens = jax.random.randint(k_tok, (batch, seq_length), 0, vocab_size, jnp.int32)

    fwd = jax.jit(fast_weights_forward)
    logits = jax.block_until_ready(fwd(tokens, params))

    ref = reference_forward(tokens, params)
    assert logits.shape == (batch, vocab_size), logits.shape
    # Kernel uses bf16 MXU inputs with f32 accumulation -> looser tolerance
    # than a pure-f32 comparison.
    assert jnp.allclose(logits, ref, atol=2e-2, rtol=2e-2), (
        float(jnp.max(jnp.abs(logits - ref))))

    print("KERNEL_OK")
</pallas_src>

<mosaic_0001>
module attributes {stable_mosaic.version = 11 : i64} {
  func.func @lstm_fc_kernel(%arg0: memref<64x128xbf16, #tpu.memory_space<vmem>>, %arg1: memref<128x512xbf16, #tpu.memory_space<vmem>>, %arg2: memref<128x512xbf16, #tpu.memory_space<vmem>>, %arg3: memref<1x512xf32, #tpu.memory_space<vmem>>, %arg4: memref<128x128xbf16, #tpu.memory_space<vmem>>, %arg5: memref<1x128xf32, #tpu.memory_space<vmem>>, %arg6: memref<8x128xf32, #tpu.memory_space<vmem>>, %arg7: memref<64x512xf32, #tpu.memory_space<vmem>>) attributes {dimension_semantics = [], scalar_prefetch = 0 : i64, scratch_operands = 1 : i64, tpu.core_type = #tpu.core_type<tc>} {
    %c0 = arith.constant 0 : index
    %c0_0 = arith.constant 0 : index
    %0 = vector.load %arg0[%c0, %c0_0] : memref<64x128xbf16, #tpu.memory_space<vmem>>, vector<64x128xbf16>
    %c0_1 = arith.constant 0 : index
    %c0_2 = arith.constant 0 : index
    %1 = vector.load %arg1[%c0_1, %c0_2] : memref<128x512xbf16, #tpu.memory_space<vmem>>, vector<128x512xbf16>
    %cst = arith.constant dense<0.000000e+00> : vector<64x512xf32>
    %2 = tpu.matmul %0, %1, %cst {dimension_numbers = #tpu.dot_dimension_numbers<[1], [0], [0], [1], [0, 0, 1, 1], [], []>} : vector<64x128xbf16>, vector<128x512xbf16>, vector<64x512xf32> -> vector<64x512xf32>
    %c0_3 = arith.constant 0 : index
    %c0_4 = arith.constant 0 : index
    %3 = vector.load %arg3[%c0_3, %c0_4] : memref<1x512xf32, #tpu.memory_space<vmem>>, vector<1x512xf32>
    %4 = vector.broadcast %3 : vector<1x512xf32> to vector<64x512xf32>
    %5 = arith.addf %2, %4 : vector<64x512xf32>
    %c0_5 = arith.constant 0 : index
    %c0_6 = arith.constant 0 : index
    %6 = vector.load %arg7[%c0_5, %c0_6] : memref<64x512xf32, #tpu.memory_space<vmem>>, vector<64x512xf32>
    tpu.vector_store %arg7[%c0_5, %c0_6], %5 {strides = array<i32>} : memref<64x512xf32, #tpu.memory_space<vmem>>, vector<64x512xf32>,
    %cst_7 = arith.constant 0.000000e+00 : f32
    %7 = vector.broadcast %cst_7 : f32 to vector<8x128xf32>
    %cst_8 = arith.constant 0.000000e+00 : f32
    %8 = vector.broadcast %cst_8 : f32 to vector<8x128xf32>
    %c0_9 = arith.constant 0 : index
    %c0_10 = arith.constant 0 : index
    %9 = vector.load %arg7[%c0_9, %c0_10] : memref<64x512xf32, #tpu.memory_space<vmem>>, vector<8x512xf32>
    %10 = arith.truncf %7 : vector<8x128xf32> to vector<8x128xbf16>
    %c0_11 = arith.constant 0 : index
    %c0_12 = arith.constant 0 : index
    %11 = vector.load %arg2[%c0_11, %c0_12] : memref<128x512xbf16, #tpu.memory_space<vmem>>, vector<128x512xbf16>
    %cst_13 = arith.constant dense<0.000000e+00> : vector<8x512xf32>
    %12 = tpu.matmul %10, %11, %cst_13 {dimension_numbers = #tpu.dot_dimension_numbers<[1], [0], [0], [1], [0, 0, 1, 1], [], []>} : vector<8x128xbf16>, vector<128x512xbf16>, vector<8x512xf32> -> vector<8x512xf32>
    %13 = arith.addf %9, %12 : vector<8x512xf32>
    %14 = vector.extract_strided_slice %13 {offsets = [0, 0], sizes = [8, 128], strides = [1, 1]} : vector<8x512xf32> to vector<8x128xf32>
    %15 = arith.negf %14 : vector<8x128xf32>
    %16 = math.exp %15 : vector<8x128xf32>
    %cst_14 = arith.constant 1.000000e+00 : f32
    %17 = vector.broadcast %cst_14 : f32 to vector<8x128xf32>
    %18 = arith.addf %17, %16 : vector<8x128xf32>
    %19 = arith.divf %17, %18 : vector<8x128xf32>
    %20 = vector.extract_strided_slice %13 {offsets = [0, 128], sizes = [8, 128], strides = [1, 1]} : vector<8x512xf32> to vector<8x128xf32>
    %21 = arith.negf %20 : vector<8x128xf32>
    %22 = math.exp %21 : vector<8x128xf32>
    %cst_15 = arith.constant 1.000000e+00 : f32
    %23 = vector.broadcast %cst_15 : f32 to vector<8x128xf32>
    %24 = arith.addf %23, %22 : vector<8x128xf32>
    %25 = arith.divf %23, %24 : vector<8x128xf32>
    %26 = vector.extract_strided_slice %13 {offsets = [0, 256], sizes = [8, 128], strides = [1, 1]} : vector<8x512xf32> to vector<8x128xf32>
    %27 = math.tanh %26 : vector<8x128xf32>
    %28 = vector.extract_strided_slice %13 {offsets = [0, 384], sizes = [8, 128], strides = [1, 1]} : vector<8x512xf32> to vector<8x128xf32>
    %29 = arith.negf %28 : vector<8x128xf32>
    %30 = math.exp %29 : vector<8x128xf32>
    %cst_16 = arith.constant 1.000000e+00 : f32
    %31 = vector.broadcast %cst_16 : f32 to vector<8x128xf32>
    %32 = arith.addf %31, %30 : vector<8x128xf32>
    %33 = arith.divf %31, %32 : vector<8x128xf32>
    %34 = arith.mulf %25, %8 : vector<8x128xf32>
    %35 = arith.mulf %19, %27 : vector<8x128xf32>
    %36 = arith.addf %34, %35 : vector<8x128xf32>
    %37 = math.tanh %36 : vector<8x128xf32>
    %38 = arith.mulf %33, %37 : vector<8x128xf32>
    %c8 = arith.constant 8 : index
    %c0_17 = arith.constant 0 : index
    %39 = vector.load %arg7[%c8, %c0_17] : memref<64x512xf32, #tpu.memory_space<vmem>>, vector<8x512xf32>
    %40 = arith.truncf %38 : vector<8x128xf32> to vector<8x128xbf16>
    %c0_18 = arith.constant 0 : index
    %c0_19 = arith.constant 0 : index
    %41 = vector.load %arg2[%c0_18, %c0_19] : memref<128x512xbf16, #tpu.memory_space<vmem>>, vector<128x512xbf16>
    %cst_20 = arith.constant dense<0.000000e+00> : vector<8x512xf32>
    %42 = tpu.matmul %40, %41, %cst_20 {dimension_numbers = #tpu.dot_dimension_numbers<[1], [0], [0], [1], [0, 0, 1, 1], [], []>} : vector<8x128xbf16>, vector<128x512xbf16>, vector<8x512xf32> -> vector<8x512xf32>
    %43 = arith.addf %39, %42 : vector<8x512xf32>
    %44 = vector.extract_strided_slice %43 {offsets = [0, 0], sizes = [8, 128], strides = [1, 1]} : vector<8x512xf32> to vector<8x128xf32>
    %45 = arith.negf %44 : vector<8x128xf32>
    %46 = math.exp %45 : vector<8x128xf32>
    %cst_21 = arith.constant 1.000000e+00 : f32
    %47 = vector.broadcast %cst_21 : f32 to vector<8x128xf32>
    %48 = arith.addf %47, %46 : vector<8x128xf32>
    %49 = arith.divf %47, %48 : vector<8x128xf32>
    %50 = vector.extract_strided_slice %43 {offsets = [0, 128], sizes = [8, 128], strides = [1, 1]} : vector<8x512xf32> to vector<8x128xf32>
    %51 = arith.negf %50 : vector<8x128xf32>
    %52 = math.exp %51 : vector<8x128xf32>
    %cst_22 = arith.constant 1.000000e+00 : f32
    %53 = vector.broadcast %cst_22 : f32 to vector<8x128xf32>
    %54 = arith.addf %53, %52 : vector<8x128xf32>
    %55 = arith.divf %53, %54 : vector<8x128xf32>
    %56 = vector.extract_strided_slice %43 {offsets = [0, 256], sizes = [8, 128], strides = [1, 1]} : vector<8x512xf32> to vector<8x128xf32>
    %57 = math.tanh %56 : vector<8x128xf32>
    %58 = vector.extract_strided_slice %43 {offsets = [0, 384], sizes = [8, 128], strides = [1, 1]} : vector<8x512xf32> to vector<8x128xf32>
    %59 = arith.negf %58 : vector<8x128xf32>
    %60 = math.exp %59 : vector<8x128xf32>
    %cst_23 = arith.constant 1.000000e+00 : f32
    %61 = vector.broadcast %cst_23 : f32 to vector<8x128xf32>
    %62 = arith.addf %61, %60 : vector<8x128xf32>
    %63 = arith.divf %61, %62 : vector<8x128xf32>
    %64 = arith.mulf %55, %36 : vector<8x128xf32>
    %65 = arith.mulf %49, %57 : vector<8x128xf32>
    %66 = arith.addf %64, %65 : vector<8x128xf32>
    %67 = math.tanh %66 : vector<8x128xf32>
    %68 = arith.mulf %63, %67 : vector<8x128xf32>
    %c16 = arith.constant 16 : index
    %c0_24 = arith.constant 0 : index
    %69 = vector.load %arg7[%c16, %c0_24] : memref<64x512xf32, #tpu.memory_space<vmem>>, vector<8x512xf32>
    %70 = arith.truncf %68 : vector<8x128xf32> to vector<8x128xbf16>
    %c0_25 = arith.constant 0 : index
    %c0_26 = arith.constant 0 : index
    %71 = vector.load %arg2[%c0_25, %c0_26] : memref<128x512xbf16, #tpu.memory_space<vmem>>, vector<128x512xbf16>
    %cst_27 = arith.constant dense<0.000000e+00> : vector<8x512xf32>
    %72 = tpu.matmul %70, %71, %cst_27 {dimension_numbers = #tpu.dot_dimension_numbers<[1], [0], [0], [1], [0, 0, 1, 1], [], []>} : vector<8x128xbf16>, vector<128x512xbf16>, vector<8x512xf32> -> vector<8x512xf32>
    %73 = arith.addf %69, %72 : vector<8x512xf32>
    %74 = vector.extract_strided_slice %73 {offsets = [0, 0], sizes = [8, 128], strides = [1, 1]} : vector<8x512xf32> to vector<8x128xf32>
    %75 = arith.negf %74 : vector<8x128xf32>
    %76 = math.exp %75 : vector<8x128xf32>
    %cst_28 = arith.constant 1.000000e+00 : f32
    %77 = vector.broadcast %cst_28 : f32 to vector<8x128xf32>
    %78 = arith.addf %77, %76 : vector<8x128xf32>
    %79 = arith.divf %77, %78 : vector<8x128xf32>
    %80 = vector.extract_strided_slice %73 {offsets = [0, 128], sizes = [8, 128], strides = [1, 1]} : vector<8x512xf32> to vector<8x128xf32>
    %81 = arith.negf %80 : vector<8x128xf32>
    %82 = math.exp %81 : vector<8x128xf32>
    %cst_29 = arith.constant 1.000000e+00 : f32
    %83 = vector.broadcast %cst_29 : f32 to vector<8x128xf32>
    %84 = arith.addf %83, %82 : vector<8x128xf32>
    %85 = arith.divf %83, %84 : vector<8x128xf32>
    %86 = vector.extract_strided_slice %73 {offsets = [0, 256], sizes = [8, 128], strides = [1, 1]} : vector<8x512xf32> to vector<8x128xf32>
    %87 = math.tanh %86 : vector<8x128xf32>
    %88 = vector.extract_strided_slice %73 {offsets = [0, 384], sizes = [8, 128], strides = [1, 1]} : vector<8x512xf32> to vector<8x128xf32>
    %89 = arith.negf %88 : vector<8x128xf32>
    %90 = math.exp %89 : vector<8x128xf32>
    %cst_30 = arith.constant 1.000000e+00 : f32
    %91 = vector.broadcast %cst_30 : f32 to vector<8x128xf32>
    %92 = arith.addf %91, %90 : vector<8x128xf32>
    %93 = arith.divf %91, %92 : vector<8x128xf32>
    %94 = arith.mulf %85, %66 : vector<8x128xf32>
    %95 = arith.mulf %79, %87 : vector<8x128xf32>
    %96 = arith.addf %94, %95 : vector<8x128xf32>
    %97 = math.tanh %96 : vector<8x128xf32>
    %98 = arith.mulf %93, %97 : vector<8x128xf32>
    %c24 = arith.constant 24 : index
    %c0_31 = arith.constant 0 : index
    %99 = vector.load %arg7[%c24, %c0_31] : memref<64x512xf32, #tpu.memory_space<vmem>>, vector<8x512xf32>
    %100 = arith.truncf %98 : vector<8x128xf32> to vector<8x128xbf16>
    %c0_32 = arith.constant 0 : index
    %c0_33 = arith.constant 0 : index
    %101 = vector.load %arg2[%c0_32, %c0_33] : memref<128x512xbf16, #tpu.memory_space<vmem>>, vector<128x512xbf16>
    %cst_34 = arith.constant dense<0.000000e+00> : vector<8x512xf32>
    %102 = tpu.matmul %100, %101, %cst_34 {dimension_numbers = #tpu.dot_dimension_numbers<[1], [0], [0], [1], [0, 0, 1, 1], [], []>} : vector<8x128xbf16>, vector<128x512xbf16>, vector<8x512xf32> -> vector<8x512xf32>
    %103 = arith.addf %99, %102 : vector<8x512xf32>
    %104 = vector.extract_strided_slice %103 {offsets = [0, 0], sizes = [8, 128], strides = [1, 1]} : vector<8x512xf32> to vector<8x128xf32>
    %105 = arith.negf %104 : vector<8x128xf32>
    %106 = math.exp %105 : vector<8x128xf32>
    %cst_35 = arith.constant 1.000000e+00 : f32
    %107 = vector.broadcast %cst_35 : f32 to vector<8x128xf32>
    %108 = arith.addf %107, %106 : vector<8x128xf32>
    %109 = arith.divf %107, %108 : vector<8x128xf32>
    %110 = vector.extract_strided_slice %103 {offsets = [0, 128], sizes = [8, 128], strides = [1, 1]} : vector<8x512xf32> to vector<8x128xf32>
    %111 = arith.negf %110 : vector<8x128xf32>
    %112 = math.exp %111 : vector<8x128xf32>
    %cst_36 = arith.constant 1.000000e+00 : f32
    %113 = vector.broadcast %cst_36 : f32 to vector<8x128xf32>
    %114 = arith.addf %113, %112 : vector<8x128xf32>
    %115 = arith.divf %113, %114 : vector<8x128xf32>
    %116 = vector.extract_strided_slice %103 {offsets = [0, 256], sizes = [8, 128], strides = [1, 1]} : vector<8x512xf32> to vector<8x128xf32>
    %117 = math.tanh %116 : vector<8x128xf32>
    %118 = vector.extract_strided_slice %103 {offsets = [0, 384], sizes = [8, 128], strides = [1, 1]} : vector<8x512xf32> to vector<8x128xf32>
    %119 = arith.negf %118 : vector<8x128xf32>
    %120 = math.exp %119 : vector<8x128xf32>
    %cst_37 = arith.constant 1.000000e+00 : f32
    %121 = vector.broadcast %cst_37 : f32 to vector<8x128xf32>
    %122 = arith.addf %121, %120 : vector<8x128xf32>
    %123 = arith.divf %121, %122 : vector<8x128xf32>
    %124 = arith.mulf %115, %96 : vector<8x128xf32>
    %125 = arith.mulf %109, %117 : vector<8x128xf32>
    %126 = arith.addf %124, %125 : vector<8x128xf32>
    %127 = math.tanh %126 : vector<8x128xf32>
    %128 = arith.mulf %123, %127 : vector<8x128xf32>
    %c32 = arith.constant 32 : index
    %c0_38 = arith.constant 0 : index
    %129 = vector.load %arg7[%c32, %c0_38] : memref<64x512xf32, #tpu.memory_space<vmem>>, vector<8x512xf32>
    %130 = arith.truncf %128 : vector<8x128xf32> to vector<8x128xbf16>
    %c0_39 = arith.constant 0 : index
    %c0_40 = arith.constant 0 : index
    %131 = vector.load %arg2[%c0_39, %c0_40] : memref<128x512xbf16, #tpu.memory_space<vmem>>, vector<128x512xbf16>
    %cst_41 = arith.constant dense<0.000000e+00> : vector<8x512xf32>
    %132 = tpu.matmul %130, %131, %cst_41 {dimension_numbers = #tpu.dot_dimension_numbers<[1], [0], [0], [1], [0, 0, 1, 1], [], []>} : vector<8x128xbf16>, vector<128x512xbf16>, vector<8x512xf32> -> vector<8x512xf32>
    %133 = arith.addf %129, %132 : vector<8x512xf32>
    %134 = vector.extract_strided_slice %133 {offsets = [0, 0], sizes = [8, 128], strides = [1, 1]} : vector<8x512xf32> to vector<8x128xf32>
    %135 = arith.negf %134 : vector<8x128xf32>
    %136 = math.exp %135 : vector<8x128xf32>
    %cst_42 = arith.constant 1.000000e+00 : f32
    %137 = vector.broadcast %cst_42 : f32 to vector<8x128xf32>
    %138 = arith.addf %137, %136 : vector<8x128xf32>
    %139 = arith.divf %137, %138 : vector<8x128xf32>
    %140 = vector.extract_strided_slice %133 {offsets = [0, 128], sizes = [8, 128], strides = [1, 1]} : vector<8x512xf32> to vector<8x128xf32>
    %141 = arith.negf %140 : vector<8x128xf32>
    %142 = math.exp %141 : vector<8x128xf32>
    %cst_43 = arith.constant 1.000000e+00 : f32
    %143 = vector.broadcast %cst_43 : f32 to vector<8x128xf32>
    %144 = arith.addf %143, %142 : vector<8x128xf32>
    %145 = arith.divf %143, %144 : vector<8x128xf32>
    %146 = vector.extract_strided_slice %133 {offsets = [0, 256], sizes = [8, 128], strides = [1, 1]} : vector<8x512xf32> to vector<8x128xf32>
    %147 = math.tanh %146 : vector<8x128xf32>
    %148 = vector.extract_strided_slice %133 {offsets = [0, 384], sizes = [8, 128], strides = [1, 1]} : vector<8x512xf32> to vector<8x128xf32>
    %149 = arith.negf %148 : vector<8x128xf32>
    %150 = math.exp %149 : vector<8x128xf32>
    %cst_44 = arith.constant 1.000000e+00 : f32
    %151 = vector.broadcast %cst_44 : f32 to vector<8x128xf32>
    %152 = arith.addf %151, %150 : vector<8x128xf32>
    %153 = arith.divf %151, %152 : vector<8x128xf32>
    %154 = arith.mulf %145, %126 : vector<8x128xf32>
    %155 = arith.mulf %139, %147 : vector<8x128xf32>
    %156 = arith.addf %154, %155 : vector<8x128xf32>
    %157 = math.tanh %156 : vector<8x128xf32>
    %158 = arith.mulf %153, %157 : vector<8x128xf32>
    %c40 = arith.constant 40 : index
    %c0_45 = arith.constant 0 : index
    %159 = vector.load %arg7[%c40, %c0_45] : memref<64x512xf32, #tpu.memory_space<vmem>>, vector<8x512xf32>
    %160 = arith.truncf %158 : vector<8x128xf32> to vector<8x128xbf16>
    %c0_46 = arith.constant 0 : index
    %c0_47 = arith.constant 0 : index
    %161 = vector.load %arg2[%c0_46, %c0_47] : memref<128x512xbf16, #tpu.memory_space<vmem>>, vector<128x512xbf16>
    %cst_48 = arith.constant dense<0.000000e+00> : vector<8x512xf32>
    %162 = tpu.matmul %160, %161, %cst_48 {dimension_numbers = #tpu.dot_dimension_numbers<[1], [0], [0], [1], [0, 0, 1, 1], [], []>} : vector<8x128xbf16>, vector<128x512xbf16>, vector<8x512xf32> -> vector<8x512xf32>
    %163 = arith.addf %159, %162 : vector<8x512xf32>
    %164 = vector.extract_strided_slice %163 {offsets = [0, 0], sizes = [8, 128], strides = [1, 1]} : vector<8x512xf32> to vector<8x128xf32>
    %165 = arith.negf %164 : vector<8x128xf32>
    %166 = math.exp %165 : vector<8x128xf32>
    %cst_49 = arith.constant 1.000000e+00 : f32
    %167 = vector.broadcast %cst_49 : f32 to vector<8x128xf32>
    %168 = arith.addf %167, %166 : vector<8x128xf32>
    %169 = arith.divf %167, %168 : vector<8x128xf32>
    %170 = vector.extract_strided_slice %163 {offsets = [0, 128], sizes = [8, 128], strides = [1, 1]} : vector<8x512xf32> to vector<8x128xf32>
    %171 = arith.negf %170 : vector<8x128xf32>
    %172 = math.exp %171 : vector<8x128xf32>
    %cst_50 = arith.constant 1.000000e+00 : f32
    %173 = vector.broadcast %cst_50 : f32 to vector<8x128xf32>
    %174 = arith.addf %173, %172 : vector<8x128xf32>
    %175 = arith.divf %173, %174 : vector<8x128xf32>
    %176 = vector.extract_strided_slice %163 {offsets = [0, 256], sizes = [8, 128], strides = [1, 1]} : vector<8x512xf32> to vector<8x128xf32>
    %177 = math.tanh %176 : vector<8x128xf32>
    %178 = vector.extract_strided_slice %163 {offsets = [0, 384], sizes = [8, 128], strides = [1, 1]} : vector<8x512xf32> to vector<8x128xf32>
    %179 = arith.negf %178 : vector<8x128xf32>
    %180 = math.exp %179 : vector<8x128xf32>
    %cst_51 = arith.constant 1.000000e+00 : f32
    %181 = vector.broadcast %cst_51 : f32 to vector<8x128xf32>
    %182 = arith.addf %181, %180 : vector<8x128xf32>
    %183 = arith.divf %181, %182 : vector<8x128xf32>
    %184 = arith.mulf %175, %156 : vector<8x128xf32>
    %185 = arith.mulf %169, %177 : vector<8x128xf32>
    %186 = arith.addf %184, %185 : vector<8x128xf32>
    %187 = math.tanh %186 : vector<8x128xf32>
    %188 = arith.mulf %183, %187 : vector<8x128xf32>
    %c48 = arith.constant 48 : index
    %c0_52 = arith.constant 0 : index
    %189 = vector.load %arg7[%c48, %c0_52] : memref<64x512xf32, #tpu.memory_space<vmem>>, vector<8x512xf32>
    %190 = arith.truncf %188 : vector<8x128xf32> to vector<8x128xbf16>
    %c0_53 = arith.constant 0 : index
    %c0_54 = arith.constant 0 : index
    %191 = vector.load %arg2[%c0_53, %c0_54] : memref<128x512xbf16, #tpu.memory_space<vmem>>, vector<128x512xbf16>
    %cst_55 = arith.constant dense<0.000000e+00> : vector<8x512xf32>
    %192 = tpu.matmul %190, %191, %cst_55 {dimension_numbers = #tpu.dot_dimension_numbers<[1], [0], [0], [1], [0, 0, 1, 1], [], []>} : vector<8x128xbf16>, vector<128x512xbf16>, vector<8x512xf32> -> vector<8x512xf32>
    %193 = arith.addf %189, %192 : vector<8x512xf32>
    %194 = vector.extract_strided_slice %193 {offsets = [0, 0], sizes = [8, 128], strides = [1, 1]} : vector<8x512xf32> to vector<8x128xf32>
    %195 = arith.negf %194 : vector<8x128xf32>
    %196 = math.exp %195 : vector<8x128xf32>
    %cst_56 = arith.constant 1.000000e+00 : f32
    %197 = vector.broadcast %cst_56 : f32 to vector<8x128xf32>
    %198 = arith.addf %197, %196 : vector<8x128xf32>
    %199 = arith.divf %197, %198 : vector<8x128xf32>
    %200 = vector.extract_strided_slice %193 {offsets = [0, 128], sizes = [8, 128], strides = [1, 1]} : vector<8x512xf32> to vector<8x128xf32>
    %201 = arith.negf %200 : vector<8x128xf32>
    %202 = math.exp %201 : vector<8x128xf32>
    %cst_57 = arith.constant 1.000000e+00 : f32
    %203 = vector.broadcast %cst_57 : f32 to vector<8x128xf32>
    %204 = arith.addf %203, %202 : vector<8x128xf32>
    %205 = arith.divf %203, %204 : vector<8x128xf32>
    %206 = vector.extract_strided_slice %193 {offsets = [0, 256], sizes = [8, 128], strides = [1, 1]} : vector<8x512xf32> to vector<8x128xf32>
    %207 = math.tanh %206 : vector<8x128xf32>
    %208 = vector.extract_strided_slice %193 {offsets = [0, 384], sizes = [8, 128], strides = [1, 1]} : vector<8x512xf32> to vector<8x128xf32>
    %209 = arith.negf %208 : vector<8x128xf32>
    %210 = math.exp %209 : vector<8x128xf32>
    %cst_58 = arith.constant 1.000000e+00 : f32
    %211 = vector.broadcast %cst_58 : f32 to vector<8x128xf32>
    %212 = arith.addf %211, %210 : vector<8x128xf32>
    %213 = arith.divf %211, %212 : vector<8x128xf32>
    %214 = arith.mulf %205, %186 : vector<8x128xf32>
    %215 = arith.mulf %199, %207 : vector<8x128xf32>
    %216 = arith.addf %214, %215 : vector<8x128xf32>
    %217 = math.tanh %216 : vector<8x128xf32>
    %218 = arith.mulf %213, %217 : vector<8x128xf32>
    %c56 = arith.constant 56 : index
    %c0_59 = arith.constant 0 : index
    %219 = vector.load %arg7[%c56, %c0_59] : memref<64x512xf32, #tpu.memory_space<vmem>>, vector<8x512xf32>
    %220 = arith.truncf %218 : vector<8x128xf32> to vector<8x128xbf16>
    %c0_60 = arith.constant 0 : index
    %c0_61 = arith.constant 0 : index
    %221 = vector.load %arg2[%c0_60, %c0_61] : memref<128x512xbf16, #tpu.memory_space<vmem>>, vector<128x512xbf16>
    %cst_62 = arith.constant dense<0.000000e+00> : vector<8x512xf32>
    %222 = tpu.matmul %220, %221, %cst_62 {dimension_numbers = #tpu.dot_dimension_numbers<[1], [0], [0], [1], [0, 0, 1, 1], [], []>} : vector<8x128xbf16>, vector<128x512xbf16>, vector<8x512xf32> -> vector<8x512xf32>
    %223 = arith.addf %219, %222 : vector<8x512xf32>
    %224 = vector.extract_strided_slice %223 {offsets = [0, 0], sizes = [8, 128], strides = [1, 1]} : vector<8x512xf32> to vector<8x128xf32>
    %225 = arith.negf %224 : vector<8x128xf32>
    %226 = math.exp %225 : vector<8x128xf32>
    %cst_63 = arith.constant 1.000000e+00 : f32
    %227 = vector.broadcast %cst_63 : f32 to vector<8x128xf32>
    %228 = arith.addf %227, %226 : vector<8x128xf32>
    %229 = arith.divf %227, %228 : vector<8x128xf32>
    %230 = vector.extract_strided_slice %223 {offsets = [0, 128], sizes = [8, 128], strides = [1, 1]} : vector<8x512xf32> to vector<8x128xf32>
    %231 = arith.negf %230 : vector<8x128xf32>
    %232 = math.exp %231 : vector<8x128xf32>
    %cst_64 = arith.constant 1.000000e+00 : f32
    %233 = vector.broadcast %cst_64 : f32 to vector<8x128xf32>
    %234 = arith.addf %233, %232 : vector<8x128xf32>
    %235 = arith.divf %233, %234 : vector<8x128xf32>
    %236 = vector.extract_strided_slice %223 {offsets = [0, 256], sizes = [8, 128], strides = [1, 1]} : vector<8x512xf32> to vector<8x128xf32>
    %237 = math.tanh %236 : vector<8x128xf32>
    %238 = vector.extract_strided_slice %223 {offsets = [0, 384], sizes = [8, 128], strides = [1, 1]} : vector<8x512xf32> to vector<8x128xf32>
    %239 = arith.negf %238 : vector<8x128xf32>
    %240 = math.exp %239 : vector<8x128xf32>
    %cst_65 = arith.constant 1.000000e+00 : f32
    %241 = vector.broadcast %cst_65 : f32 to vector<8x128xf32>
    %242 = arith.addf %241, %240 : vector<8x128xf32>
    %243 = arith.divf %241, %242 : vector<8x128xf32>
    %244 = arith.mulf %235, %216 : vector<8x128xf32>
    %245 = arith.mulf %229, %237 : vector<8x128xf32>
    %246 = arith.addf %244, %245 : vector<8x128xf32>
    %247 = math.tanh %246 : vector<8x128xf32>
    %248 = arith.mulf %243, %247 : vector<8x128xf32>
    %249 = arith.truncf %248 : vector<8x128xf32> to vector<8x128xbf16>
    %c0_66 = arith.constant 0 : index
    %c0_67 = arith.constant 0 : index
    %250 = vector.load %arg4[%c0_66, %c0_67] : memref<128x128xbf16, #tpu.memory_space<vmem>>, vector<128x128xbf16>
    %cst_68 = arith.constant dense<0.000000e+00> : vector<8x128xf32>
    %251 = tpu.matmul %249, %250, %cst_68 {dimension_numbers = #tpu.dot_dimension_numbers<[1], [0], [0], [1], [0, 0, 1, 1], [], []>} : vector<8x128xbf16>, vector<128x128xbf16>, vector<8x128xf32> -> vector<8x128xf32>
    %c0_69 = arith.constant 0 : index
    %c0_70 = arith.constant 0 : index
    %252 = vector.load %arg5[%c0_69, %c0_70] : memref<1x128xf32, #tpu.memory_space<vmem>>, vector<1x128xf32>
    %253 = vector.broadcast %252 : vector<1x128xf32> to vector<8x128xf32>
    %254 = arith.addf %251, %253 : vector<8x128xf32>
    %c0_71 = arith.constant 0 : index
    %c0_72 = arith.constant 0 : index
    %255 = vector.load %arg6[%c0_71, %c0_72] : memref<8x128xf32, #tpu.memory_space<vmem>>, vector<8x128xf32>
    tpu.vector_store %arg6[%c0_71, %c0_72], %254 {strides = array<i32>} : memref<8x128xf32, #tpu.memory_space<vmem>>, vector<8x128xf32>,
    return
  }
}

</mosaic_0001>

<bundles_post_ra>
// kernel: fast_weights_forward.1
= control target key start
LH: loop header
LB: loop body
LE: loop exit
PB: predicated region body
PF: predicated region fallthrough
CT: control target
= control target key end

     0   :  { %v2967_v1 = vmov 0   ;;  %vm2079_vm0 = vmmov 0   ;;  %s2960_s1 = inlined_call_operand.vmem [shape: bf16[128,512], index: 1, kind: input, shape index: {}]   ;;  %s2961_s0 = inlined_call_operand.vmem [shape: bf16[64,128], index: 0, kind: input, shape index: {}]   ;;  %s2962_s2 = inlined_call_operand.vmem [shape: bf16[128,512], index: 2, kind: input, shape index: {}]   ;;  %s2963_s3 = inlined_call_operand.vmem [shape: f32[1,512], index: 3, kind: input, shape index: {}]   ;;  %s2964_s4 = inlined_call_operand.vmem [shape: bf16[128,128], index: 4, kind: input, shape index: {}]   ;;  %s2965_s5 = inlined_call_operand.vmem [shape: f32[1,128], index: 5, kind: input, shape index: {}]   ;;  %s2966_s6 = inlined_call_operand.vmem [shape: f32[8,128], index: 6, kind: output, shape index: {}]  }
   0x1   :  { %v1809_v0 = vld [vmem:[%s2960_s1 + $0x4] ss:$16 sps:$4 sm:$0xff]   ;;  %302 = vmatprep.mubr.bf16.mxu0 %v2967_v1  ;;  %375 = vmatprep.mubr.bf16.mxu1 %v2967_v1  ;;  %v1811_v2 = vld [vmem:[%s2960_s1 + $0xc] ss:$16 sps:$4 sm:$0xff]   ;;  %v1813_v3 = vld [vmem:[%s2960_s1] ss:$16 sps:$4 sm:$0xff]  }
   0x2   :  { %270 = vmatprep.subr.bf16.mxu0 %v1809_v0  ;;  %v1814_v4 = vld [vmem:[%s2960_s1 + $0x8] ss:$16 sps:$4 sm:$0xff]   ;;  %343 = vmatprep.subr.bf16.mxu1 %v1811_v2  ;;  %v1815_v5 = vld [vmem:[%s2960_s1 + $0x24] ss:$16 sps:$4 sm:$0xff]   ;;  %v1817_v6 = vld [vmem:[%s2960_s1 + $0x2c] ss:$16 sps:$4 sm:$0xff]  }
   0x3   :  { %271 = vmatpush1.bf16.msra.mxu0 %v1813_v3  ;;  %344 = vmatpush1.bf16.msra.mxu1 %v1814_v4  ;;  %v1819_v7 = vld [vmem:[%s2960_s1 + $0x20] ss:$16 sps:$4 sm:$0xff]   ;;  %v1820_v8 = vld [vmem:[%s2960_s1 + $0x28] ss:$16 sps:$4 sm:$0xff]   ;;  %v1821_v9 = vld [vmem:[%s2960_s1 + $0x44] ss:$16 sps:$4 sm:$0xff]  }
   0x4   :  { %272 = vmatprep.subr.bf16.mxu0 %v1815_v5  ;;  %345 = vmatprep.subr.bf16.mxu1 %v1817_v6  ;;  %v1823_v10 = vld [vmem:[%s2960_s1 + $0x4c] ss:$16 sps:$4 sm:$0xff]   ;;  %v1825_v11 = vld [vmem:[%s2960_s1 + $0x40] ss:$16 sps:$4 sm:$0xff]   ;;  %v1826_v12 = vld [vmem:[%s2960_s1 + $0x48] ss:$16 sps:$4 sm:$0xff]   ;;  %v66_v6 = vlaneseq }
   0x5   :  { %v1827_v13 = vld [vmem:[%s2960_s1 + $0x64] ss:$16 sps:$4 sm:$0xff]   ;;  %v1829_v14 = vld [vmem:[%s2960_s1 + $0x6c] ss:$16 sps:$4 sm:$0xff]   ;;  %v1831_v15 = vld [vmem:[%s2960_s1 + $0x60] ss:$16 sps:$4 sm:$0xff]  }
   0x6   :  { %v1832_v16 = vld [vmem:[%s2960_s1 + $0x68] ss:$16 sps:$4 sm:$0xff]   ;;  %v1833_v17 = vld [vmem:[%s2960_s1 + $0x84] ss:$16 sps:$4 sm:$0xff]   ;;  %v1835_v18 = vld [vmem:[%s2960_s1 + $0x8c] ss:$16 sps:$4 sm:$0xff]  }
   0x7   :  { %273 = vmatpush1.bf16.msra.mxu0 %v1819_v7  ;;  %346 = vmatpush1.bf16.msra.mxu1 %v1820_v8  ;;  %v1837_v19 = vld [vmem:[%s2960_s1 + $0x80] ss:$16 sps:$4 sm:$0xff]   ;;  %v1838_v20 = vld [vmem:[%s2960_s1 + $0x88] ss:$16 sps:$4 sm:$0xff]   ;;  %v1839_v21 = vld [vmem:[%s2960_s1 + $0xa4] ss:$16 sps:$4 sm:$0xff]  }
   0x8   :  { %274 = vmatprep.subr.bf16.mxu0 %v1821_v9  ;;  %347 = vmatprep.subr.bf16.mxu1 %v1823_v10  ;;  %v1841_v22 = vld [vmem:[%s2960_s1 + $0xac] ss:$16 sps:$4 sm:$0xff]   ;;  %v1843_v23 = vld [vmem:[%s2960_s1 + $0xa0] ss:$16 sps:$4 sm:$0xff]   ;;  %v1844_v24 = vld [vmem:[%s2960_s1 + $0xa8] ss:$16 sps:$4 sm:$0xff]  }
   0x9   :  { %v1845_v25 = vld [vmem:[%s2960_s1 + $0xc4] ss:$16 sps:$4 sm:$0xff]   ;;  %v1847_v26 = vld [vmem:[%s2960_s1 + $0xcc] ss:$16 sps:$4 sm:$0xff]   ;;  %v1849_v27 = vld [vmem:[%s2960_s1 + $0xc0] ss:$16 sps:$4 sm:$0xff]  }
   0xa   :  { %v1850_v28 = vld [vmem:[%s2960_s1 + $0xc8] ss:$16 sps:$4 sm:$0xff]   ;;  %v1851_v29 = vld [vmem:[%s2960_s1 + $0xe4] ss:$16 sps:$4 sm:$0xff]   ;;  %v1853_v30 = vld [vmem:[%s2960_s1 + $0xec] ss:$16 sps:$4 sm:$0xff]  }
   0xb   :  { %275 = vmatpush1.bf16.msra.mxu0 %v1825_v11  ;;  %348 = vmatpush1.bf16.msra.mxu1 %v1826_v12  ;;  %v1855_v31 = vld [vmem:[%s2960_s1 + $0xe0] ss:$16 sps:$4 sm:$0xff]   ;;  %v1856_v32 = vld [vmem:[%s2960_s1 + $0xe8] ss:$16 sps:$4 sm:$0xff]   ;;  %v2216_v33 = vld [vmem:[%s2962_s2 + $0x4] ss:$16 sps:$4 sm:$0xff]  }
   0xc   :  { %276 = vmatprep.subr.bf16.mxu0 %v1827_v13  ;;  %349 = vmatprep.subr.bf16.mxu1 %v1829_v14  ;;  %v2221_v34 = vld [vmem:[%s2962_s2 + $0xc] ss:$16 sps:$4 sm:$0xff]   ;;  %v1857_v35 = vld [vmem:[%s2961_s0] sm:$0xff]   ;;  %v2234_v37 = vld [vmem:[%s2962_s2 + $0x8] ss:$16 sps:$4 sm:$0xff]   ;;  %v67_v7 = vshrl.u32 %v66_v6, 7 }
   0xd   :  { %v2229_v36 = vld [vmem:[%s2962_s2] ss:$16 sps:$4 sm:$0xff]   ;;  %v2241_v38 = vld [vmem:[%s2962_s2 + $0x24] ss:$16 sps:$4 sm:$0xff]   ;;  %v2246_v39 = vld [vmem:[%s2962_s2 + $0x2c] ss:$16 sps:$4 sm:$0xff]  }
   0xe   :  { %v2251_v40 = vld [vmem:[%s2962_s2 + $0x20] ss:$16 sps:$4 sm:$0xff]   ;;  %v2258_v41 = vld [vmem:[%s2962_s2 + $0x28] ss:$16 sps:$4 sm:$0xff]   ;;  %v2265_v42 = vld [vmem:[%s2962_s2 + $0x44] ss:$16 sps:$4 sm:$0xff]  }
   0xf   :  { %277 = vmatpush1.bf16.msra.mxu0 %v1831_v15  ;;  %350 = vmatpush1.bf16.msra.mxu1 %v1832_v16  ;;  %v2270_v43 = vld [vmem:[%s2962_s2 + $0x4c] ss:$16 sps:$4 sm:$0xff]   ;;  %v2280_v45 = vld [vmem:[%s2962_s2 + $0x40] ss:$16 sps:$4 sm:$0xff]   ;;  %v2285_v46 = vld [vmem:[%s2962_s2 + $0x48] ss:$16 sps:$4 sm:$0xff]  }
  0x10   :  { %278 = vmatprep.subr.bf16.mxu0 %v1833_v17  ;;  %351 = vmatprep.subr.bf16.mxu1 %v1835_v18  ;;  %v1870_v44 = vld [vmem:[%s2961_s0 + $0x8] sm:$0xff]   ;;  %v2292_v47 = vld [vmem:[%s2962_s2 + $0x64] ss:$16 sps:$4 sm:$0xff]   ;;  %v2304_v49 = vld [vmem:[%s2962_s2 + $0x60] ss:$16 sps:$4 sm:$0xff]   ;;  %v76_v8 = vsub.s32 2, %v67_v7 }
  0x11   :  { %v2299_v48 = vld [vmem:[%s2962_s2 + $0x6c] ss:$16 sps:$4 sm:$0xff]   ;;  %v2309_v50 = vld [vmem:[%s2962_s2 + $0x68] ss:$16 sps:$4 sm:$0xff]   ;;  %v2316_v51 = vld [vmem:[%s2962_s2 + $0x84] ss:$16 sps:$4 sm:$0xff]  }
  0x12   :  { %v2323_v52 = vld [vmem:[%s2962_s2 + $0x8c] ss:$16 sps:$4 sm:$0xff]   ;;  %v1883_v53 = vld [vmem:[%s2961_s0 + $0x10] sm:$0xff]   ;;  %v2340_v55 = vld [vmem:[%s2962_s2 + $0x88] ss:$16 sps:$4 sm:$0xff]   ;;  %v80_v9 = vsub.s32 3, %v67_v7 }
  0x13   :  { %279 = vmatpush1.bf16.msra.mxu0 %v1837_v19  ;;  %352 = vmatpush1.bf16.msra.mxu1 %v1838_v20  ;;  %v2335_v54 = vld [vmem:[%s2962_s2 + $0x80] ss:$16 sps:$4 sm:$0xff]   ;;  %v2347_v56 = vld [vmem:[%s2962_s2 + $0xa4] ss:$16 sps:$4 sm:$0xff]   ;;  %v2352_v57 = vld [vmem:[%s2962_s2 + $0xac] ss:$16 sps:$4 sm:$0xff]  }
  0x14   :  { %280 = vmatprep.subr.bf16.mxu0 %v1839_v21  ;;  %353 = vmatprep.subr.bf16.mxu1 %v1841_v22  ;;  %v2359_v58 = vld [vmem:[%s2962_s2 + $0xa0] ss:$16 sps:$4 sm:$0xff]   ;;  %v2364_v59 = vld [vmem:[%s2962_s2 + $0xa8] ss:$16 sps:$4 sm:$0xff]   ;;  %v2371_v60 = vld [vmem:[%s2962_s2 + $0xc4] ss:$16 sps:$4 sm:$0xff]  }
  0x15   :  { %v2376_v61 = vld [vmem:[%s2962_s2 + $0xcc] ss:$16 sps:$4 sm:$0xff]   ;;  %v2388_v63 = vld [vmem:[%s2962_s2 + $0xc0] ss:$16 sps:$4 sm:$0xff]   ;;  %v2393_v0 = vld [vmem:[%s2962_s2 + $0xc8] ss:$16 sps:$4 sm:$0xff]  }
  0x16   :  { %v1896_v62 = vld [vmem:[%s2961_s0 + $0x18] sm:$0xff]   ;;  %v2400_v2 = vld [vmem:[%s2962_s2 + $0xe4] ss:$16 sps:$4 sm:$0xff]   ;;  %v2412_v4 = vld [vmem:[%s2962_s2 + $0xe0] ss:$16 sps:$4 sm:$0xff]   ;;  %v68_v10 = vsub.s32 0, %v67_v7 }
  0x17   :  { %281 = vmatpush1.bf16.msra.mxu0 %v1843_v23  ;;  %354 = vmatpush1.bf16.msra.mxu1 %v1844_v24  ;;  %v2405_v3 = vld [vmem:[%s2962_s2 + $0xec] ss:$16 sps:$4 sm:$0xff]   ;;  %v2417_v5 = vld [vmem:[%s2962_s2 + $0xe8] ss:$16 sps:$4 sm:$0xff]   ;;  %v64_v11 = vld [vmem:[%s2963_s3] sm:$0xf] }
  0x18   :  { %282 = vmatprep.subr.bf16.mxu0 %v1845_v25  ;;  %355 = vmatprep.subr.bf16.mxu1 %v1847_v26  ;;  %v72_v12 = vsub.s32 1, %v67_v7  ;;  %v2466_v13 = vrot.slane %v64_v11, %v76_v8  ;;  %v2472_v16 = vrot.slane %v64_v11, %v80_v9  ;;  %v69_v17 = vrot.slane %v64_v11, %v68_v10 }
  0x1a   :  { %v73_v20 = vrot.slane %v64_v11, %v72_v12 }
  0x1b   :  { %283 = vmatpush1.bf16.msra.mxu0 %v1849_v27  ;;  %356 = vmatpush1.bf16.msra.mxu1 %v1850_v28 }
  0x1c   :  { %284 = vmatprep.subr.bf16.mxu0 %v1851_v29  ;;  %357 = vmatprep.subr.bf16.mxu1 %v1853_v30 }
  0x1f   :  { %285 = vmatpush1.bf16.msra.mxu0 %v1855_v31  ;;  %358 = vmatpush1.bf16.msra.mxu1 %v1856_v32 }
  0x20   :  { %644 = vmatprep.subr.bf16.mxu0 %v2216_v33  ;;  %685 = vmatprep.subr.bf16.mxu1 %v2221_v34 }
  0x22   :  { %303 = vmatmul.mubr.bf16.vlgmr.msra.gmra.mrb[0].mxu0 %v1857_v35  ;;  %376 = vmatmul.mubr.bf16.vlgmr.msra.gmra.mrb[0].mxu1 %v1857_v35 }
  0x23   :  { %645 = vmatpush1.bf16.msra.mxu0 %v2229_v36  ;;  %686 = vmatpush1.bf16.msra.mxu1 %v2234_v37 }
  0x24   :  { %646 = vmatprep.subr.bf16.mxu0 %v2241_v38  ;;  %687 = vmatprep.subr.bf16.mxu1 %v2246_v39 }
  0x25   :  { %312 = vmatprep.mubr.bf16.mxu0 %v2967_v1  ;;  %385 = vmatprep.mubr.bf16.mxu1 %v2967_v1 }
  0x27   :  { %647 = vmatpush1.bf16.msra.mxu0 %v2251_v40  ;;  %688 = vmatpush1.bf16.msra.mxu1 %v2258_v41 }
  0x28   :  { %648 = vmatprep.subr.bf16.mxu0 %v2265_v42  ;;  %689 = vmatprep.subr.bf16.mxu1 %v2270_v43 }
  0x2a   :  { %313 = vmatmul.mubr.bf16.gmra.mrb[4].mxu0 %v1870_v44  ;;  %386 = vmatmul.mubr.bf16.gmra.mrb[4].mxu1 %v1870_v44 }
  0x2b   :  { %649 = vmatpush1.bf16.msra.mxu0 %v2280_v45  ;;  %690 = vmatpush1.bf16.msra.mxu1 %v2285_v46 }
  0x2c   :  { %650 = vmatprep.subr.bf16.mxu0 %v2292_v47  ;;  %691 = vmatprep.subr.bf16.mxu1 %v2299_v48 }
  0x2d   :  { %322 = vmatprep.mubr.bf16.mxu0 %v2967_v1  ;;  %395 = vmatprep.mubr.bf16.mxu1 %v2967_v1 }
  0x2f   :  { %651 = vmatpush1.bf16.msra.mxu0 %v2304_v49  ;;  %692 = vmatpush1.bf16.msra.mxu1 %v2309_v50 }
  0x30   :  { %652 = vmatprep.subr.bf16.mxu0 %v2316_v51  ;;  %693 = vmatprep.subr.bf16.mxu1 %v2323_v52 }
  0x32   :  { %323 = vmatmul.mubr.bf16.gmra.mrb[8].mxu0 %v1883_v53  ;;  %396 = vmatmul.mubr.bf16.gmra.mrb[8].mxu1 %v1883_v53 }
  0x33   :  { %653 = vmatpush1.bf16.msra.mxu0 %v2335_v54  ;;  %694 = vmatpush1.bf16.msra.mxu1 %v2340_v55 }
  0x34   :  { %654 = vmatprep.subr.bf16.mxu0 %v2347_v56  ;;  %695 = vmatprep.subr.bf16.mxu1 %v2352_v57 }
  0x35   :  { %332 = vmatprep.mubr.bf16.mxu0 %v2967_v1  ;;  %405 = vmatprep.mubr.bf16.mxu1 %v2967_v1 }
  0x37   :  { %655 = vmatpush1.bf16.msra.mxu0 %v2359_v58  ;;  %696 = vmatpush1.bf16.msra.mxu1 %v2364_v59 }
  0x38   :  { %656 = vmatprep.subr.bf16.mxu0 %v2371_v60  ;;  %697 = vmatprep.subr.bf16.mxu1 %v2376_v61 }
  0x3a   :  { %333 = vmatmul.mubr.bf16.gmra.mrb[12].mxu0 %v1896_v62  ;;  %406 = vmatmul.mubr.bf16.gmra.mrb[12].mxu1 %v1896_v62 }
  0x3b   :  { %657 = vmatpush1.bf16.msra.mxu0 %v2388_v63  ;;  %698 = vmatpush1.bf16.msra.mxu1 %v2393_v0 }
  0x3c   :  { %658 = vmatprep.subr.bf16.mxu0 %v2400_v2  ;;  %699 = vmatprep.subr.bf16.mxu1 %v2405_v3 }
  0x3d   :  { %676 = vmatprep.mubr.bf16.mxu0 %v2967_v1  ;;  %717 = vmatprep.mubr.bf16.mxu1 %v2967_v1 }
  0x3f   :  { %659 = vmatpush1.bf16.msra.mxu0 %v2412_v4  ;;  %700 = vmatpush1.bf16.msra.mxu1 %v2417_v5 }
  0x40   :  { %759 = vmatprep.subr.bf16.mxu0 %v2216_v33  ;;  %800 = vmatprep.subr.bf16.mxu1 %v2221_v34 }
  0x42   :  { %677 = vmatmul.mubr.bf16.vlgmr.msra.gmra.mrb[16].mxu0 %v2967_v1  ;;  %718 = vmatmul.mubr.bf16.vlgmr.msra.gmra.mrb[16].mxu1 %v2967_v1 }
  0x43   :  { %760 = vmatpush1.bf16.msra.mxu0 %v2229_v36  ;;  %801 = vmatpush1.bf16.msra.mxu1 %v2234_v37 }
  0x44   :  { %761 = vmatprep.subr.bf16.mxu0 %v2241_v38  ;;  %802 = vmatprep.subr.bf16.mxu1 %v2246_v39 }
  0x45   :  { %791 = vmatprep.mubr.bf16.mxu0 %v2967_v1  ;;  %832 = vmatprep.mubr.bf16.mxu1 %v2967_v1 }
  0x47   :  { %762 = vmatpush1.bf16.msra.mxu0 %v2251_v40  ;;  %803 = vmatpush1.bf16.msra.mxu1 %v2258_v41 }
  0x48   :  { %763 = vmatprep.subr.bf16.mxu0 %v2265_v42  ;;  %804 = vmatprep.subr.bf16.mxu1 %v2270_v43 }
  0x4b   :  { %764 = vmatpush1.bf16.msra.mxu0 %v2280_v45  ;;  %805 = vmatpush1.bf16.msra.mxu1 %v2285_v46 }
  0x4c   :  { %765 = vmatprep.subr.bf16.mxu0 %v2292_v47  ;;  %806 = vmatprep.subr.bf16.mxu1 %v2299_v48 }
  0x4f   :  { %766 = vmatpush1.bf16.msra.mxu0 %v2304_v49  ;;  %807 = vmatpush1.bf16.msra.mxu1 %v2309_v50 }
  0x50   :  { %767 = vmatprep.subr.bf16.mxu0 %v2316_v51  ;;  %808 = vmatprep.subr.bf16.mxu1 %v2323_v52 }
  0x53   :  { %768 = vmatpush1.bf16.msra.mxu0 %v2335_v54  ;;  %809 = vmatpush1.bf16.msra.mxu1 %v2340_v55 }
  0x54   :  { %769 = vmatprep.subr.bf16.mxu0 %v2347_v56  ;;  %810 = vmatprep.subr.bf16.mxu1 %v2352_v57 }
  0x57   :  { %770 = vmatpush1.bf16.msra.mxu0 %v2359_v58  ;;  %811 = vmatpush1.bf16.msra.mxu1 %v2364_v59 }
  0x58   :  { %771 = vmatprep.subr.bf16.mxu0 %v2371_v60  ;;  %812 = vmatprep.subr.bf16.mxu1 %v2376_v61 }
  0x5b   :  { %772 = vmatpush1.bf16.msra.mxu0 %v2388_v63  ;;  %813 = vmatpush1.bf16.msra.mxu1 %v2393_v0 }
  0x5c   :  { %773 = vmatprep.subr.bf16.mxu0 %v2400_v2  ;;  %814 = vmatprep.subr.bf16.mxu1 %v2405_v3 }
  0x5f   :  { %774 = vmatpush1.bf16.msra.mxu0 %v2412_v4  ;;  %815 = vmatpush1.bf16.msra.mxu1 %v2417_v5 }
  0x60   :  { %874 = vmatprep.subr.bf16.mxu0 %v2216_v33  ;;  %915 = vmatprep.subr.bf16.mxu1 %v2221_v34 }
  0xf5   :  { %v2468_v14 = vpop.f32.mrb[0].mxu0  ;;  %v2470_v15 = vpop.f32.mrb[0].mxu1 }
  0xf6   :  { %v306_v18 = vpop.f32.mrb[1].mxu0  ;;  %v379_v19 = vpop.f32.mrb[1].mxu1 }
  0xf7   :  { %v308_v21 = vpop.f32.mrb[2].mxu0  ;;  %v381_v22 = vpop.f32.mrb[2].mxu1 }
  0xf8   :  { %v2474_v23 = vadd.f32 %v308_v21, %v69_v17  ;;  %v310_v24 = vpop.f32.mrb[3].mxu0  ;;  %v2477_v25 = vadd.f32 %v381_v22, %v2466_v13  ;;  %v383_v26 = vpop.f32.mrb[3].mxu1 }
  0xf9   :  { %v2479_v27 = vadd.f32 %v310_v24, %v73_v20  ;;  %v2482_v28 = vadd.f32 %v383_v26, %v2472_v16 }
  0xfd   :  { %v314_v29 = vpop.f32.mrb[4].mxu0  ;;  %v387_v30 = vpop.f32.mrb[4].mxu1 }
  0xfe   :  { %v2484_v31 = vadd.f32 %v314_v29, %v69_v17  ;;  %v316_v32 = vpop.f32.mrb[5].mxu0  ;;  %v2487_v35 = vadd.f32 %v387_v30, %v2466_v13  ;;  %v389_v44 = vpop.f32.mrb[5].mxu1 }
  0xff   :  { %v2489_v53 = vadd.f32 %v316_v32, %v73_v20  ;;  %v318_v62 = vpop.f32.mrb[6].mxu0  ;;  %v2492_v6 = vadd.f32 %v389_v44, %v2472_v16  ;;  %v391_v7 = vpop.f32.mrb[6].mxu1 }
 0x100   :  { %v2494_v8 = vadd.f32 %v318_v62, %v69_v17  ;;  %v320_v9 = vpop.f32.mrb[7].mxu0  ;;  %v2497_v10 = vadd.f32 %v391_v7, %v2466_v13  ;;  %v393_v11 = vpop.f32.mrb[7].mxu1 }
 0x101   :  { %2969 = vst [vmem:[#allocation3_spill] sm:$0xff] %v2492_v6  ;;  %v2499_v12 = vadd.f32 %v320_v9, %v73_v20  ;;  %v2502_v21 = vadd.f32 %v393_v11, %v2472_v16 }
 0x102   :  { %2970 = vst [vmem:[#allocation4_spill] sm:$0xff] %v2494_v8  ;;  %2971 = vst [vmem:[#allocation5_spill] sm:$0xff] %v2497_v10 }
 0x103   :  { %2972 = vst [vmem:[#allocation6_spill] sm:$0xff] %v2499_v12  ;;  %2973 = vst [vmem:[#allocation7_spill] sm:$0xff] %v2502_v21 }
 0x105   :  { %v324_v22 = vpop.f32.mrb[8].mxu0  ;;  %v397_v24 = vpop.f32.mrb[8].mxu1 }
 0x106   :  { %v2504_v26 = vadd.f32 %v324_v22, %v69_v17  ;;  %v326_v29 = vpop.f32.mrb[9].mxu0  ;;  %v2507_v30 = vadd.f32 %v397_v24, %v2466_v13  ;;  %v399_v32 = vpop.f32.mrb[9].mxu1 }
 0x107   :  { %v2509_v44 = vadd.f32 %v326_v29, %v73_v20  ;;  %v328_v62 = vpop.f32.mrb[10].mxu0  ;;  %v2512_v7 = vadd.f32 %v399_v32, %v2472_v16  ;;  %v401_v9 = vpop.f32.mrb[10].mxu1 }
 0x108   :  { %2974 = vst [vmem:[#allocation8_spill] sm:$0xff] %v2504_v26  ;;  %2975 = vst [vmem:[#allocation9_spill] sm:$0xff] %v2507_v30  ;;  %v2514_v1 = vadd.f32 %v328_v62, %v69_v17  ;;  %v330_v11 = vpop.f32.mrb[11].mxu0  ;;  %v2517_v21 = vadd.f32 %v401_v9, %v2466_v13  ;;  %v403_v22 = vpop.f32.mrb[11].mxu1 }
 0x109   :  { %2976 = vst [vmem:[#allocation10_spill] sm:$0xff] %v2509_v44  ;;  %2977 = vst [vmem:[#allocation11_spill] sm:$0xff] %v2512_v7  ;;  %v2519_v26 = vadd.f32 %v330_v11, %v73_v20  ;;  %v2522_v24 = vadd.f32 %v403_v22, %v2472_v16 }
 0x10a   :  { %2978 = vst [vmem:[#allocation12_spill] sm:$0xff] %v2514_v1  ;;  %2979 = vst [vmem:[#allocation13_spill] sm:$0xff] %v2517_v21 }
 0x10b   :  { %2980 = vst [vmem:[#allocation14_spill] sm:$0xff] %v2519_v26  ;;  %2981 = vst [vmem:[#allocation15_spill] sm:$0xff] %v2522_v24 }
 0x10d   :  { %v334_v30 = vpop.f32.mrb[12].mxu0  ;;  %v407_v29 = vpop.f32.mrb[12].mxu1 }
 0x10e   :  { %v2524_v44 = vadd.f32 %v334_v30, %v69_v17  ;;  %v336_v12 = vpop.f32.mrb[13].mxu0  ;;  %v2527_v32 = vadd.f32 %v407_v29, %v2466_v13  ;;  %v409_v62 = vpop.f32.mrb[13].mxu1 }
 0x10f   :  { %v2529_v1 = vadd.f32 %v336_v12, %v73_v20  ;;  %v338_v7 = vpop.f32.mrb[14].mxu0  ;;  %v2532_v9 = vadd.f32 %v409_v62, %v2472_v16  ;;  %v411_v11 = vpop.f32.mrb[14].mxu1  ;;  %v305_v12 = vadd.f32 %v2468_v14, %v69_v17  ;;  %v307_v62 = vadd.f32 %v306_v18, %v73_v20 }
 0x110   :  { %2982 = vst [vmem:[#allocation16_spill] sm:$0xff] %v2524_v44  ;;  %2983 = vst [vmem:[#allocation17_spill] sm:$0xff] %v2527_v32  ;;  %v2534_v26 = vadd.f32 %v338_v7, %v69_v17  ;;  %v340_v22 = vpop.f32.mrb[15].mxu0  ;;  %v2537_v24 = vadd.f32 %v411_v11, %v2466_v13  ;;  %v413_v30 = vpop.f32.mrb[15].mxu1 }
 0x111   :  { %2984 = vst [vmem:[#allocation18_spill] sm:$0xff] %v2529_v1  ;;  %2985 = vst [vmem:[#allocation19_spill] sm:$0xff] %v2532_v9  ;;  %v2539_v44 = vadd.f32 %v340_v22, %v73_v20  ;;  %v2542_v29 = vadd.f32 %v413_v30, %v2472_v16  ;;  %v378_v1 = vadd.f32 %v2470_v15, %v2466_v13 }
 0x112   :  { %2986 = vst [vmem:[#allocation20_spill] sm:$0xff] %v2534_v26  ;;  %2987 = vst [vmem:[#allocation21_spill] sm:$0xff] %v2537_v24  ;;  %v380_v9 = vadd.f32 %v379_v19, %v2472_v16 }
 0x113   :  { %2988 = vst [vmem:[#allocation22_spill] sm:$0xff] %v2539_v44  ;;  %2989 = vst [vmem:[#allocation23_spill] sm:$0xff] %v2542_v29 }
 0x115   :  { %v678_v7 = vpop.f32.mrb[16].mxu0  ;;  %v719_v26 = vpop.f32.mrb[16].mxu1 }
 0x116   :  { %v726_v32 = vadd.f32 %v678_v7, %v305_v12  ;;  %v728_v21 = vadd.f32 %v719_v26, %v378_v1  ;;  %v680_v11 = vpop.f32.mrb[17].mxu0  ;;  %v721_v24 = vpop.f32.mrb[17].mxu1 }
 0x117   :  { %v727_v10 = vadd.f32 %v680_v11, %v307_v62  ;;  %v729_v22 = vadd.f32 %v721_v24, %v380_v9  ;;  %v682_v44 = vpop.f32.mrb[18].mxu0  ;;  %v723_v8 = vpop.f32.mrb[18].mxu1 }
 0x118   :  { %v1744_v30 = vmul.f32 -1.442695, %v726_v32  ;;  %v683_v29 = vpop.f32.mrb[19].mxu0  ;;  %v724_v6 = vpop.f32.mrb[19].mxu1 }
 0x119   :  { %v1745_v14 = vmul.f32 -1.442695, %v727_v10  ;;  %v1746_v13 = vmul.f32 -1.442695, %v729_v22 }
 0x11a   :  { %1917 = vpow2.f32 %v1744_v30 }
 0x11b   :  { %1919 = vpow2.f32 %v1745_v14 }
 0x11c   :  { %1921 = vpow2.f32 %v1746_v13 }
 0x11d   :  { %1923 = vtanh.f32 %v728_v21  ;;  %v2990_v21 = vmov 0  }
 0x124   :  { %v1918_v15 = vpop.eup %1917 }
 0x125   :  { %v1920_v17 = vpop.eup %1919  ;;  %v733_v16 = vadd.f32 1.0, %v1918_v15 }
 0x126   :  { %v739_v18 = vadd.f32 1.0, %v1920_v17  ;;  %v1922_v1 = vpop.eup %1921 }
 0x127   :  { %1925 = vrcp.f32 %v733_v16  ;;  %v1924_v19 = vpop.eup %1923  ;;  %v746_v44 = vadd.f32 1.0, %v1922_v1 }
 0x128   :  { %1927 = vrcp.f32 %v739_v18 }
 0x129   :  { %1929 = vrcp.f32 %v746_v44 }
 0x131   :  { %v1926_v20 = vpop.eup %1925 }
 0x132   :  { %v1928_v26 = vpop.eup %1927  ;;  %v750_v8 = vmul.f32 %v1926_v20, %v1924_v19 }
 0x133   :  { %v749_v24 = vmul.f32 0.0, %v1928_v26  ;;  %v1930_v10 = vpop.eup %1929 }
 0x135   :  { %v2548_v6 = vadd.f32 %v750_v8, %v749_v24 }
 0x137   :  { %1931 = vtanh.f32 %v2548_v6 }
 0x141   :  { %v1932_v32 = vpop.eup %1931 }
 0x142   :  { %v753_v9 = vmul.f32 %v1932_v32, %v1930_v10 }
 0x144   :  { %v758_v29 = vpack.c.bf16 %v753_v9, %v753_v9 }
 0x146   :  { %792 = vmatmul.mubr.bf16.vlgmr.msra.gmra.mrb[20].mxu0 %v758_v29  ;;  %833 = vmatmul.mubr.bf16.vlgmr.msra.gmra.mrb[20].mxu1 %v758_v29 }
 0x147   :  { %875 = vmatpush1.bf16.msra.mxu0 %v2229_v36  ;;  %916 = vmatpush1.bf16.msra.mxu1 %v2234_v37 }
 0x148   :  { %876 = vmatprep.subr.bf16.mxu0 %v2241_v38  ;;  %917 = vmatprep.subr.bf16.mxu1 %v2246_v39 }
 0x149   :  { %906 = vmatprep.mubr.bf16.mxu0 %v2990_v21  ;;  %947 = vmatprep.mubr.bf16.mxu1 %v2990_v21 }
 0x14b   :  { %877 = vmatpush1.bf16.msra.mxu0 %v2251_v40  ;;  %918 = vmatpush1.bf16.msra.mxu1 %v2258_v41 }
 0x14c   :  { %878 = vmatprep.subr.bf16.mxu0 %v2265_v42  ;;  %919 = vmatprep.subr.bf16.mxu1 %v2270_v43 }
 0x14f   :  { %879 = vmatpush1.bf16.msra.mxu0 %v2280_v45  ;;  %920 = vmatpush1.bf16.msra.mxu1 %v2285_v46 }
 0x150   :  { %880 = vmatprep.subr.bf16.mxu0 %v2292_v47  ;;  %921 = vmatprep.subr.bf16.mxu1 %v2299_v48 }
 0x153   :  { %881 = vmatpush1.bf16.msra.mxu0 %v2304_v49  ;;  %922 = vmatpush1.bf16.msra.mxu1 %v2309_v50 }
 0x154   :  { %882 = vmatprep.subr.bf16.mxu0 %v2316_v51  ;;  %923 = vmatprep.subr.bf16.mxu1 %v2323_v52 }
 0x157   :  { %883 = vmatpush1.bf16.msra.mxu0 %v2335_v54  ;;  %924 = vmatpush1.bf16.msra.mxu1 %v2340_v55 }
 0x158   :  { %884 = vmatprep.subr.bf16.mxu0 %v2347_v56  ;;  %925 = vmatprep.subr.bf16.mxu1 %v2352_v57 }
 0x15b   :  { %885 = vmatpush1.bf16.msra.mxu0 %v2359_v58  ;;  %926 = vmatpush1.bf16.msra.mxu1 %v2364_v59 }
 0x15c   :  { %886 = vmatprep.subr.bf16.mxu0 %v2371_v60  ;;  %927 = vmatprep.subr.bf16.mxu1 %v2376_v61 }
 0x15f   :  { %887 = vmatpush1.bf16.msra.mxu0 %v2388_v63  ;;  %928 = vmatpush1.bf16.msra.mxu1 %v2393_v0 }
 0x160   :  { %888 = vmatprep.subr.bf16.mxu0 %v2400_v2  ;;  %929 = vmatprep.subr.bf16.mxu1 %v2405_v3 }
 0x163   :  { %889 = vmatpush1.bf16.msra.mxu0 %v2412_v4  ;;  %930 = vmatpush1.bf16.msra.mxu1 %v2417_v5 }
 0x164   :  { %989 = vmatprep.subr.bf16.mxu0 %v2216_v33  ;;  %1030 = vmatprep.subr.bf16.mxu1 %v2221_v34 }
 0x219   :  { %v793_v12 = vpop.f32.mrb[20].mxu0  ;;  %v834_v62 = vpop.f32.mrb[20].mxu1 }
 0x21a   :  { %v841_v7 = vadd.f32 %v793_v12, %v2474_v23  ;;  %v843_v11 = vadd.f32 %v834_v62, %v2477_v25  ;;  %v795_v22 = vpop.f32.mrb[21].mxu0  ;;  %v836_v30 = vpop.f32.mrb[21].mxu1 }
 0x21b   :  { %v842_v14 = vadd.f32 %v795_v22, %v2479_v27  ;;  %v844_v13 = vadd.f32 %v836_v30, %v2482_v28  ;;  %v797_v15 = vpop.f32.mrb[22].mxu0  ;;  %v838_v17 = vpop.f32.mrb[22].mxu1 }
 0x21c   :  { %v1747_v16 = vmul.f32 -1.442695, %v841_v7  ;;  %v798_v18 = vpop.f32.mrb[23].mxu0  ;;  %v839_v1 = vpop.f32.mrb[23].mxu1 }
 0x21d   :  { %v1748_v19 = vmul.f32 -1.442695, %v842_v14  ;;  %v1749_v20 = vmul.f32 -1.442695, %v844_v13 }
 0x21e   :  { %1933 = vpow2.f32 %v1747_v16  ;;  %v2991_v16 = vld [vmem:[#allocation3_spill] sm:$0xff] }
 0x21f   :  { %1935 = vpow2.f32 %v1748_v19 }
 0x220   :  { %1937 = vpow2.f32 %v1749_v20 }
 0x221   :  { %1939 = vtanh.f32 %v843_v11 }
 0x228   :  { %v1934_v26 = vpop.eup %1933 }
 0x229   :  { %v1936_v8 = vpop.eup %1935  ;;  %v848_v23 = vadd.f32 1.0, %v1934_v26 }
 0x22a   :  { %v854_v25 = vadd.f32 1.0, %v1936_v8  ;;  %v1938_v27 = vpop.eup %1937 }
 0x22b   :  { %1941 = vrcp.f32 %v848_v23  ;;  %v1940_v44 = vpop.eup %1939  ;;  %v861_v32 = vadd.f32 1.0, %v1938_v27 }
 0x22c   :  { %1943 = vrcp.f32 %v854_v25 }
 0x22d   :  { %1945 = vrcp.f32 %v861_v32 }
 0x235   :  { %v1942_v28 = vpop.eup %1941 }
 0x236   :  { %v1944_v24 = vpop.eup %1943  ;;  %v865_v10 = vmul.f32 %v1942_v28, %v1940_v44 }
 0x237   :  { %v864_v9 = vmul.f32 %v1944_v24, %v2548_v6  ;;  %v1946_v12 = vpop.eup %1945 }
 0x239   :  { %v2590_v29 = vadd.f32 %v865_v10, %v864_v9 }
 0x23b   :  { %1947 = vtanh.f32 %v2590_v29 }
 0x245   :  { %v1948_v62 = vpop.eup %1947 }
 0x246   :  { %v868_v7 = vmul.f32 %v1948_v62, %v1946_v12 }
 0x248   :  { %v873_v11 = vpack.c.bf16 %v868_v7, %v868_v7 }
 0x24a   :  { %907 = vmatmul.mubr.bf16.vlgmr.msra.gmra.mrb[24].mxu0 %v873_v11  ;;  %948 = vmatmul.mubr.bf16.vlgmr.msra.gmra.mrb[24].mxu1 %v873_v11 }
 0x24b   :  { %990 = vmatpush1.bf16.msra.mxu0 %v2229_v36  ;;  %1031 = vmatpush1.bf16.msra.mxu1 %v2234_v37 }
 0x24c   :  { %991 = vmatprep.subr.bf16.mxu0 %v2241_v38  ;;  %1032 = vmatprep.subr.bf16.mxu1 %v2246_v39 }
 0x24d   :  { %1021 = vmatprep.mubr.bf16.mxu0 %v2990_v21  ;;  %1062 = vmatprep.mubr.bf16.mxu1 %v2990_v21 }
 0x24f   :  { %992 = vmatpush1.bf16.msra.mxu0 %v2251_v40  ;;  %1033 = vmatpush1.bf16.msra.mxu1 %v2258_v41 }
 0x250   :  { %993 = vmatprep.subr.bf16.mxu0 %v2265_v42  ;;  %1034 = vmatprep.subr.bf16.mxu1 %v2270_v43 }
 0x253   :  { %994 = vmatpush1.bf16.msra.mxu0 %v2280_v45  ;;  %1035 = vmatpush1.bf16.msra.mxu1 %v2285_v46 }
 0x254   :  { %995 = vmatprep.subr.bf16.mxu0 %v2292_v47  ;;  %1036 = vmatprep.subr.bf16.mxu1 %v2299_v48 }
 0x257   :  { %996 = vmatpush1.bf16.msra.mxu0 %v2304_v49  ;;  %1037 = vmatpush1.bf16.msra.mxu1 %v2309_v50 }
 0x258   :  { %997 = vmatprep.subr.bf16.mxu0 %v2316_v51  ;;  %1038 = vmatprep.subr.bf16.mxu1 %v2323_v52 }
 0x25b   :  { %998 = vmatpush1.bf16.msra.mxu0 %v2335_v54  ;;  %1039 = vmatpush1.bf16.msra.mxu1 %v2340_v55 }
 0x25c   :  { %999 = vmatprep.subr.bf16.mxu0 %v2347_v56  ;;  %1040 = vmatprep.subr.bf16.mxu1 %v2352_v57 }
 0x25f   :  { %1000 = vmatpush1.bf16.msra.mxu0 %v2359_v58  ;;  %1041 = vmatpush1.bf16.msra.mxu1 %v2364_v59 }
 0x260   :  { %1001 = vmatprep.subr.bf16.mxu0 %v2371_v60  ;;  %1042 = vmatprep.subr.bf16.mxu1 %v2376_v61 }
 0x263   :  { %1002 = vmatpush1.bf16.msra.mxu0 %v2388_v63  ;;  %1043 = vmatpush1.bf16.msra.mxu1 %v2393_v0 }
 0x264   :  { %1003 = vmatprep.subr.bf16.mxu0 %v2400_v2  ;;  %1044 = vmatprep.subr.bf16.mxu1 %v2405_v3 }
 0x267   :  { %1004 = vmatpush1.bf16.msra.mxu0 %v2412_v4  ;;  %1045 = vmatpush1.bf16.msra.mxu1 %v2417_v5 }
 0x268   :  { %1104 = vmatprep.subr.bf16.mxu0 %v2216_v33  ;;  %1145 = vmatprep.subr.bf16.mxu1 %v2221_v34 }
 0x31d   :  { %v908_v6 = vpop.f32.mrb[24].mxu0  ;;  %v949_v22 = vpop.f32.mrb[24].mxu1 }
 0x31e   :  { %v956_v30 = vadd.f32 %v908_v6, %v2484_v31  ;;  %v958_v14 = vadd.f32 %v949_v22, %v2487_v35  ;;  %v910_v13 = vpop.f32.mrb[25].mxu0  ;;  %v951_v15 = vpop.f32.mrb[25].mxu1 }
 0x31f   :  { %v957_v17 = vadd.f32 %v910_v13, %v2489_v53  ;;  %v959_v18 = vadd.f32 %v951_v15, %v2991_v16  ;;  %v912_v1 = vpop.f32.mrb[26].mxu0  ;;  %v953_v19 = vpop.f32.mrb[26].mxu1  ;;  %v2993_v15 = vld [vmem:[#allocation5_spill] sm:$0xff] }
 0x320   :  { %v1750_v20 = vmul.f32 -1.442695, %v956_v30  ;;  %v913_v26 = vpop.f32.mrb[27].mxu0  ;;  %v954_v8 = vpop.f32.mrb[27].mxu1  ;;  %v2994_v1 = vld [vmem:[#allocation6_spill] sm:$0xff] }
 0x321   :  { %v1751_v23 = vmul.f32 -1.442695, %v957_v17  ;;  %v1752_v25 = vmul.f32 -1.442695, %v959_v18 }
 0x322   :  { %1949 = vpow2.f32 %v1750_v20  ;;  %v2995_v20 = vld [vmem:[#allocation7_spill] sm:$0xff] }
 0x323   :  { %1951 = vpow2.f32 %v1751_v23 }
 0x324   :  { %1953 = vpow2.f32 %v1752_v25 }
 0x325   :  { %1955 = vtanh.f32 %v958_v14  ;;  %v2992_v14 = vld [vmem:[#allocation4_spill] sm:$0xff] }
 0x32c   :  { %v1950_v27 = vpop.eup %1949 }
 0x32d   :  { %v1952_v44 = vpop.eup %1951  ;;  %v963_v31 = vadd.f32 1.0, %v1950_v27 }
 0x32e   :  { %v969_v35 = vadd.f32 1.0, %v1952_v44  ;;  %v1954_v53 = vpop.eup %1953 }
 0x32f   :  { %1957 = vrcp.f32 %v963_v31  ;;  %v1956_v28 = vpop.eup %1955  ;;  %v976_v9 = vadd.f32 1.0, %v1954_v53 }
 0x330   :  { %1959 = vrcp.f32 %v969_v35 }
 0x331   :  { %1961 = vrcp.f32 %v976_v9 }
 0x339   :  { %v1958_v24 = vpop.eup %1957 }
 0x33a   :  { %v1960_v10 = vpop.eup %1959  ;;  %v980_v32 = vmul.f32 %v1958_v24, %v1956_v28 }
 0x33b   :  { %v979_v12 = vmul.f32 %v1960_v10, %v2590_v29  ;;  %v1962_v7 = vpop.eup %1961 }
 0x33d   :  { %v2632_v62 = vadd.f32 %v980_v32, %v979_v12 }
 0x33f   :  { %1963 = vtanh.f32 %v2632_v62 }
 0x349   :  { %v1964_v11 = vpop.eup %1963 }
 0x34a   :  { %v983_v6 = vmul.f32 %v1964_v11, %v1962_v7 }
 0x34c   :  { %v988_v22 = vpack.c.bf16 %v983_v6, %v983_v6 }
 0x34e   :  { %1022 = vmatmul.mubr.bf16.vlgmr.msra.gmra.mrb[28].mxu0 %v988_v22  ;;  %1063 = vmatmul.mubr.bf16.vlgmr.msra.gmra.mrb[28].mxu1 %v988_v22 }
 0x34f   :  { %1105 = vmatpush1.bf16.msra.mxu0 %v2229_v36  ;;  %1146 = vmatpush1.bf16.msra.mxu1 %v2234_v37 }
 0x350   :  { %1106 = vmatprep.subr.bf16.mxu0 %v2241_v38  ;;  %1147 = vmatprep.subr.bf16.mxu1 %v2246_v39 }
 0x351   :  { %1136 = vmatprep.mubr.bf16.mxu0 %v2990_v21  ;;  %1177 = vmatprep.mubr.bf16.mxu1 %v2990_v21 }
 0x353   :  { %1107 = vmatpush1.bf16.msra.mxu0 %v2251_v40  ;;  %1148 = vmatpush1.bf16.msra.mxu1 %v2258_v41 }
 0x354   :  { %1108 = vmatprep.subr.bf16.mxu0 %v2265_v42  ;;  %1149 = vmatprep.subr.bf16.mxu1 %v2270_v43 }
 0x357   :  { %1109 = vmatpush1.bf16.msra.mxu0 %v2280_v45  ;;  %1150 = vmatpush1.bf16.msra.mxu1 %v2285_v46 }
 0x358   :  { %1110 = vmatprep.subr.bf16.mxu0 %v2292_v47  ;;  %1151 = vmatprep.subr.bf16.mxu1 %v2299_v48 }
 0x35b   :  { %1111 = vmatpush1.bf16.msra.mxu0 %v2304_v49  ;;  %1152 = vmatpush1.bf16.msra.mxu1 %v2309_v50 }
 0x35c   :  { %1112 = vmatprep.subr.bf16.mxu0 %v2316_v51  ;;  %1153 = vmatprep.subr.bf16.mxu1 %v2323_v52 }
 0x35f   :  { %1113 = vmatpush1.bf16.msra.mxu0 %v2335_v54  ;;  %1154 = vmatpush1.bf16.msra.mxu1 %v2340_v55 }
 0x360   :  { %1114 = vmatprep.subr.bf16.mxu0 %v2347_v56  ;;  %1155 = vmatprep.subr.bf16.mxu1 %v2352_v57 }
 0x363   :  { %1115 = vmatpush1.bf16.msra.mxu0 %v2359_v58  ;;  %1156 = vmatpush1.bf16.msra.mxu1 %v2364_v59 }
 0x364   :  { %1116 = vmatprep.subr.bf16.mxu0 %v2371_v60  ;;  %1157 = vmatprep.subr.bf16.mxu1 %v2376_v61 }
 0x367   :  { %1117 = vmatpush1.bf16.msra.mxu0 %v2388_v63  ;;  %1158 = vmatpush1.bf16.msra.mxu1 %v2393_v0 }
 0x368   :  { %1118 = vmatprep.subr.bf16.mxu0 %v2400_v2  ;;  %1159 = vmatprep.subr.bf16.mxu1 %v2405_v3 }
 0x36b   :  { %1119 = vmatpush1.bf16.msra.mxu0 %v2412_v4  ;;  %1160 = vmatpush1.bf16.msra.mxu1 %v2417_v5 }
 0x36c   :  { %1219 = vmatprep.subr.bf16.mxu0 %v2216_v33  ;;  %1260 = vmatprep.subr.bf16.mxu1 %v2221_v34 }
 0x421   :  { %v1023_v29 = vpop.f32.mrb[28].mxu0  ;;  %v1064_v30 = vpop.f32.mrb[28].mxu1 }
 0x422   :  { %v1071_v13 = vadd.f32 %v1023_v29, %v2992_v14  ;;  %v1073_v17 = vadd.f32 %v1064_v30, %v2993_v15  ;;  %v1025_v16 = vpop.f32.mrb[29].mxu0  ;;  %v1066_v18 = vpop.f32.mrb[29].mxu1 }
 0x423   :  { %v1072_v19 = vadd.f32 %v1025_v16, %v2994_v1  ;;  %v1074_v26 = vadd.f32 %v1066_v18, %v2995_v20  ;;  %v1027_v8 = vpop.f32.mrb[30].mxu0  ;;  %v1068_v23 = vpop.f32.mrb[30].mxu1 }
 0x424   :  { %v1753_v25 = vmul.f32 -1.442695, %v1071_v13  ;;  %v1028_v27 = vpop.f32.mrb[31].mxu0  ;;  %v1069_v44 = vpop.f32.mrb[31].mxu1 }
 0x425   :  { %v1754_v33 = vmul.f32 -1.442695, %v1072_v19  ;;  %v1755_v34 = vmul.f32 -1.442695, %v1074_v26 }
 0x426   :  { %1965 = vpow2.f32 %v1753_v25 }
 0x427   :  { %1967 = vpow2.f32 %v1754_v33 }
 0x428   :  { %1969 = vpow2.f32 %v1755_v34 }
 0x429   :  { %1971 = vtanh.f32 %v1073_v17 }
 0x430   :  { %v1966_v31 = vpop.eup %1965 }
 0x431   :  { %v1968_v35 = vpop.eup %1967  ;;  %v1078_v53 = vadd.f32 1.0, %v1966_v31 }
 0x432   :  { %v1084_v28 = vadd.f32 1.0, %v1968_v35  ;;  %v1970_v24 = vpop.eup %1969 }
 0x433   :  { %1973 = vrcp.f32 %v1078_v53  ;;  %v1972_v10 = vpop.eup %1971  ;;  %v1091_v7 = vadd.f32 1.0, %v1970_v24  ;;  %v2732_v53 = vld [vmem:[%s2962_s2] ss:$16 sps:$4 sm:$0xff]   ;;  %v2744_v24 = vld [vmem:[%s2962_s2 + $0x24] ss:$16 sps:$4 sm:$0xff]  }
 0x434   :  { %1975 = vrcp.f32 %v1084_v28  ;;  %v2738_v28 = vld [vmem:[%s2962_s2 + $0x8] ss:$16 sps:$4 sm:$0xff]  }
 0x435   :  { %1977 = vrcp.f32 %v1091_v7  ;;  %v2776_v7 = vld [vmem:[%s2962_s2 + $0x4c] ss:$16 sps:$4 sm:$0xff]  }
 0x43d   :  { %v1974_v32 = vpop.eup %1973 }
 0x43e   :  { %v1976_v9 = vpop.eup %1975  ;;  %v1095_v12 = vmul.f32 %v1974_v32, %v1972_v10  ;;  %v2750_v10 = vld [vmem:[%s2962_s2 + $0x2c] ss:$16 sps:$4 sm:$0xff]   ;;  %v2758_v32 = vld [vmem:[%s2962_s2 + $0x20] ss:$16 sps:$4 sm:$0xff]  }
 0x43f   :  { %v1094_v11 = vmul.f32 %v1976_v9, %v2632_v62  ;;  %v1978_v22 = vpop.eup %1977  ;;  %v2764_v9 = vld [vmem:[%s2962_s2 + $0x28] ss:$16 sps:$4 sm:$0xff]  }
 0x441   :  { %v2674_v6 = vadd.f32 %v1095_v12, %v1094_v11  ;;  %v2770_v12 = vld [vmem:[%s2962_s2 + $0x44] ss:$16 sps:$4 sm:$0xff]   ;;  %v2782_v11 = vld [vmem:[%s2962_s2 + $0x40] ss:$16 sps:$4 sm:$0xff]  }
 0x443   :  { %1979 = vtanh.f32 %v2674_v6 }
 0x44d   :  { %v1980_v29 = vpop.eup %1979 }
 0x44e   :  { %v1098_v30 = vmul.f32 %v1980_v29, %v1978_v22  ;;  %v2794_v22 = vld [vmem:[%s2962_s2 + $0x64] ss:$16 sps:$4 sm:$0xff]   ;;  %v2800_v29 = vld [vmem:[%s2962_s2 + $0x6c] ss:$16 sps:$4 sm:$0xff]  }
 0x450   :  { %v1103_v14 = vpack.c.bf16 %v1098_v30, %v1098_v30  ;;  %v2806_v30 = vld [vmem:[%s2962_s2 + $0x60] ss:$16 sps:$4 sm:$0xff]  }
 0x452   :  { %1137 = vmatmul.mubr.bf16.vlgmr.msra.gmra.mrb[32].mxu0 %v1103_v14  ;;  %1178 = vmatmul.mubr.bf16.vlgmr.msra.gmra.mrb[32].mxu1 %v1103_v14  ;;  %v2812_v14 = vld [vmem:[%s2962_s2 + $0x68] ss:$16 sps:$4 sm:$0xff]  }
 0x453   :  { %1220 = vmatpush1.bf16.msra.mxu0 %v2229_v36  ;;  %1261 = vmatpush1.bf16.msra.mxu1 %v2234_v37  ;;  %v2712_v36 = vld [vmem:[%s2962_s2 + $0x4] ss:$16 sps:$4 sm:$0xff]   ;;  %v2718_v37 = vld [vmem:[%s2962_s2 + $0xc] ss:$16 sps:$4 sm:$0xff]  }
 0x454   :  { %1221 = vmatprep.subr.bf16.mxu0 %v2241_v38  ;;  %1262 = vmatprep.subr.bf16.mxu1 %v2246_v39 }
 0x455   :  { %1251 = vmatprep.mubr.bf16.mxu0 %v2990_v21  ;;  %1292 = vmatprep.mubr.bf16.mxu1 %v2990_v21 }
 0x457   :  { %1222 = vmatpush1.bf16.msra.mxu0 %v2251_v40  ;;  %1263 = vmatpush1.bf16.msra.mxu1 %v2258_v41  ;;  %v2996_v40 = vld [vmem:[#allocation8_spill] sm:$0xff] }
 0x458   :  { %1223 = vmatprep.subr.bf16.mxu0 %v2265_v42  ;;  %1264 = vmatprep.subr.bf16.mxu1 %v2270_v43  ;;  %v2997_v42 = vld [vmem:[#allocation9_spill] sm:$0xff] }
 0x45b   :  { %1224 = vmatpush1.bf16.msra.mxu0 %v2280_v45  ;;  %1265 = vmatpush1.bf16.msra.mxu1 %v2285_v46 }
 0x45c   :  { %1225 = vmatprep.subr.bf16.mxu0 %v2292_v47  ;;  %1266 = vmatprep.subr.bf16.mxu1 %v2299_v48  ;;  %v2998_v47 = vld [vmem:[#allocation10_spill] sm:$0xff] }
 0x45f   :  { %1226 = vmatpush1.bf16.msra.mxu0 %v2304_v49  ;;  %1267 = vmatpush1.bf16.msra.mxu1 %v2309_v50  ;;  %v2999_v49 = vld [vmem:[#allocation11_spill] sm:$0xff] }
 0x460   :  { %1227 = vmatprep.subr.bf16.mxu0 %v2316_v51  ;;  %1268 = vmatprep.subr.bf16.mxu1 %v2323_v52 }
 0x463   :  { %1228 = vmatpush1.bf16.msra.mxu0 %v2335_v54  ;;  %1269 = vmatpush1.bf16.msra.mxu1 %v2340_v55 }
 0x464   :  { %1229 = vmatprep.subr.bf16.mxu0 %v2347_v56  ;;  %1270 = vmatprep.subr.bf16.mxu1 %v2352_v57 }
 0x467   :  { %1230 = vmatpush1.bf16.msra.mxu0 %v2359_v58  ;;  %1271 = vmatpush1.bf16.msra.mxu1 %v2364_v59 }
 0x468   :  { %1231 = vmatprep.subr.bf16.mxu0 %v2371_v60  ;;  %1272 = vmatprep.subr.bf16.mxu1 %v2376_v61 }
 0x46b   :  { %1232 = vmatpush1.bf16.msra.mxu0 %v2388_v63  ;;  %1273 = vmatpush1.bf16.msra.mxu1 %v2393_v0 }
 0x46c   :  { %1233 = vmatprep.subr.bf16.mxu0 %v2400_v2  ;;  %1274 = vmatprep.subr.bf16.mxu1 %v2405_v3 }
 0x46f   :  { %1234 = vmatpush1.bf16.msra.mxu0 %v2412_v4  ;;  %1275 = vmatpush1.bf16.msra.mxu1 %v2417_v5 }
 0x470   :  { %1334 = vmatprep.subr.bf16.mxu0 %v2712_v36  ;;  %1375 = vmatprep.subr.bf16.mxu1 %v2718_v37 }
 0x525   :  { %v1138_v38 = vpop.f32.mrb[32].mxu0  ;;  %v1179_v39 = vpop.f32.mrb[32].mxu1 }
 0x526   :  { %v1186_v41 = vadd.f32 %v1138_v38, %v2996_v40  ;;  %v1188_v43 = vadd.f32 %v1179_v39, %v2997_v42  ;;  %v1140_v45 = vpop.f32.mrb[33].mxu0  ;;  %v1181_v46 = vpop.f32.mrb[33].mxu1  ;;  %v2818_v38 = vld [vmem:[%s2962_s2 + $0x84] ss:$16 sps:$4 sm:$0xff]   ;;  %v2824_v39 = vld [vmem:[%s2962_s2 + $0x8c] ss:$16 sps:$4 sm:$0xff]  }
 0x527   :  { %v1187_v48 = vadd.f32 %v1140_v45, %v2998_v47  ;;  %v1189_v50 = vadd.f32 %v1181_v46, %v2999_v49  ;;  %v1142_v51 = vpop.f32.mrb[34].mxu0  ;;  %v1183_v52 = vpop.f32.mrb[34].mxu1  ;;  %v2830_v40 = vld [vmem:[%s2962_s2 + $0x80] ss:$16 sps:$4 sm:$0xff]   ;;  %v3002_v42 = vld [vmem:[#allocation14_spill] sm:$0xff] }
 0x528   :  { %v1756_v54 = vmul.f32 -1.442695, %v1186_v41  ;;  %v1143_v55 = vpop.f32.mrb[35].mxu0  ;;  %v1184_v62 = vpop.f32.mrb[35].mxu1  ;;  %v2836_v41 = vld [vmem:[%s2962_s2 + $0x88] ss:$16 sps:$4 sm:$0xff]  }
 0x529   :  { %v1757_v13 = vmul.f32 -1.442695, %v1187_v48  ;;  %v1758_v15 = vmul.f32 -1.442695, %v1189_v50 }
 0x52a   :  { %1981 = vpow2.f32 %v1756_v54 }
 0x52b   :  { %1983 = vpow2.f32 %v1757_v13 }
 0x52c   :  { %1985 = vpow2.f32 %v1758_v15 }
 0x52d   :  { %1987 = vtanh.f32 %v1188_v43  ;;  %v3003_v43 = vld [vmem:[#allocation15_spill] sm:$0xff] }
 0x534   :  { %v1982_v17 = vpop.eup %1981 }
 0x535   :  { %v1984_v16 = vpop.eup %1983  ;;  %v1193_v18 = vadd.f32 1.0, %v1982_v17 }
 0x536   :  { %v1199_v1 = vadd.f32 1.0, %v1984_v16  ;;  %v1986_v19 = vpop.eup %1985 }
 0x537   :  { %1989 = vrcp.f32 %v1193_v18  ;;  %v1988_v20 = vpop.eup %1987  ;;  %v1206_v25 = vadd.f32 1.0, %v1986_v19 }
 0x538   :  { %1991 = vrcp.f32 %v1199_v1 }
 0x539   :  { %1993 = vrcp.f32 %v1206_v25  ;;  %v2069_v25 = vld [vmem:[%s2962_s2 + $0xc4] ss:$16 sps:$4 sm:$0xff]  }
 0x541   :  { %v1990_v26 = vpop.eup %1989 }
 0x542   :  { %v1992_v8 = vpop.eup %1991  ;;  %v1210_v23 = vmul.f32 %v1990_v26, %v1988_v20  ;;  %v2066_v26 = vld [vmem:[%s2962_s2 + $0xac] ss:$16 sps:$4 sm:$0xff]  }
 0x543   :  { %v1209_v27 = vmul.f32 %v1992_v8, %v2674_v6  ;;  %v1994_v33 = vpop.eup %1993  ;;  %v2788_v6 = vld [vmem:[%s2962_s2 + $0x48] ss:$16 sps:$4 sm:$0xff]   ;;  %v2067_v8 = vld [vmem:[%s2962_s2 + $0xa0] ss:$16 sps:$4 sm:$0xff]  }
 0x545   :  { %v2726_v44 = vadd.f32 %v1210_v23, %v1209_v27  ;;  %v2068_v23 = vld [vmem:[%s2962_s2 + $0xa8] ss:$16 sps:$4 sm:$0xff]   ;;  %v2070_v27 = vld [vmem:[%s2962_s2 + $0xcc] ss:$16 sps:$4 sm:$0xff]  }
 0x547   :  { %1995 = vtanh.f32 %v2726_v44 }
 0x551   :  { %v1996_v34 = vpop.eup %1995 }
 0x552   :  { %v1213_v31 = vmul.f32 %v1996_v34, %v1994_v33  ;;  %v2072_v33 = vld [vmem:[%s2962_s2 + $0xc8] ss:$16 sps:$4 sm:$0xff]   ;;  %v2073_v34 = vld [vmem:[%s2962_s2 + $0xe4] ss:$16 sps:$4 sm:$0xff]  }
 0x554   :  { %v1218_v35 = vpack.c.bf16 %v1213_v31, %v1213_v31  ;;  %v2074_v31 = vld [vmem:[%s2962_s2 + $0xec] ss:$16 sps:$4 sm:$0xff]  }
 0x556   :  { %1252 = vmatmul.mubr.bf16.vlgmr.msra.gmra.mrb[36].mxu0 %v1218_v35  ;;  %1293 = vmatmul.mubr.bf16.vlgmr.msra.gmra.mrb[36].mxu1 %v1218_v35  ;;  %v2075_v35 = vld [vmem:[%s2962_s2 + $0xe0] ss:$16 sps:$4 sm:$0xff]  }
 0x557   :  { %1335 = vmatpush1.bf16.msra.mxu0 %v2732_v53  ;;  %1376 = vmatpush1.bf16.msra.mxu1 %v2738_v28 }
 0x558   :  { %1336 = vmatprep.subr.bf16.mxu0 %v2744_v24  ;;  %1377 = vmatprep.subr.bf16.mxu1 %v2750_v10 }
 0x559   :  { %1366 = vmatprep.mubr.bf16.mxu0 %v2990_v21  ;;  %1407 = vmatprep.mubr.bf16.mxu1 %v2990_v21 }
 0x55b   :  { %1337 = vmatpush1.bf16.msra.mxu0 %v2758_v32  ;;  %1378 = vmatpush1.bf16.msra.mxu1 %v2764_v9 }
 0x55c   :  { %1338 = vmatprep.subr.bf16.mxu0 %v2770_v12  ;;  %1379 = vmatprep.subr.bf16.mxu1 %v2776_v7 }
 0x55f   :  { %1339 = vmatpush1.bf16.msra.mxu0 %v2782_v11  ;;  %1380 = vmatpush1.bf16.msra.mxu1 %v2788_v6 }
 0x560   :  { %1340 = vmatprep.subr.bf16.mxu0 %v2794_v22  ;;  %1381 = vmatprep.subr.bf16.mxu1 %v2800_v29 }
 0x563   :  { %1341 = vmatpush1.bf16.msra.mxu0 %v2806_v30  ;;  %1382 = vmatpush1.bf16.msra.mxu1 %v2812_v14 }
 0x564   :  { %1342 = vmatprep.subr.bf16.mxu0 %v2818_v38  ;;  %1383 = vmatprep.subr.bf16.mxu1 %v2824_v39 }
 0x567   :  { %1343 = vmatpush1.bf16.msra.mxu0 %v2830_v40  ;;  %1384 = vmatpush1.bf16.msra.mxu1 %v2836_v41 }
 0x568   :  { %1344 = vmatprep.subr.bf16.mxu0 %v2347_v56  ;;  %1385 = vmatprep.subr.bf16.mxu1 %v2352_v57 }
 0x56b   :  { %1345 = vmatpush1.bf16.msra.mxu0 %v2359_v58  ;;  %1386 = vmatpush1.bf16.msra.mxu1 %v2364_v59  ;;  %v3000_v58 = vld [vmem:[#allocation12_spill] sm:$0xff] }
 0x56c   :  { %1346 = vmatprep.subr.bf16.mxu0 %v2371_v60  ;;  %1387 = vmatprep.subr.bf16.mxu1 %v2376_v61  ;;  %v3001_v60 = vld [vmem:[#allocation13_spill] sm:$0xff] }
 0x56f   :  { %1347 = vmatpush1.bf16.msra.mxu0 %v2388_v63  ;;  %1388 = vmatpush1.bf16.msra.mxu1 %v2393_v0 }
 0x570   :  { %1348 = vmatprep.subr.bf16.mxu0 %v2400_v2  ;;  %1389 = vmatprep.subr.bf16.mxu1 %v2405_v3 }
 0x573   :  { %1349 = vmatpush1.bf16.msra.mxu0 %v2412_v4  ;;  %1390 = vmatpush1.bf16.msra.mxu1 %v2417_v5 }
 0x574   :  { %1449 = vmatprep.subr.bf16.mxu0 %v2712_v36  ;;  %1490 = vmatprep.subr.bf16.mxu1 %v2718_v37 }
 0x629   :  { %v1253_v56 = vpop.f32.mrb[36].mxu0  ;;  %v1294_v57 = vpop.f32.mrb[36].mxu1 }
 0x62a   :  { %v1301_v59 = vadd.f32 %v1253_v56, %v3000_v58  ;;  %v1303_v61 = vadd.f32 %v1294_v57, %v3001_v60  ;;  %v1255_v63 = vpop.f32.mrb[37].mxu0  ;;  %v1296_v0 = vpop.f32.mrb[37].mxu1 }
 0x62b   :  { %v1302_v2 = vadd.f32 %v1255_v63, %v3002_v42  ;;  %v1304_v3 = vadd.f32 %v1296_v0, %v3003_v43  ;;  %v1257_v45 = vpop.f32.mrb[38].mxu0  ;;  %v1298_v4 = vpop.f32.mrb[38].mxu1 }
 0x62c   :  { %v1759_v46 = vmul.f32 -1.442695, %v1301_v59  ;;  %v1258_v5 = vpop.f32.mrb[39].mxu0  ;;  %v1299_v47 = vpop.f32.mrb[39].mxu1 }
 0x62d   :  { %v1760_v36 = vmul.f32 -1.442695, %v1302_v2  ;;  %v1761_v37 = vmul.f32 -1.442695, %v1304_v3 }
 0x62e   :  { %1997 = vpow2.f32 %v1759_v46 }
 0x62f   :  { %1999 = vpow2.f32 %v1760_v36 }
 0x630   :  { %2001 = vpow2.f32 %v1761_v37  ;;  %v1909_v37 = vld [vmem:[%s2964_s4] sm:$0xff]  }
 0x631   :  { %2003 = vtanh.f32 %v1303_v61 }
 0x638   :  { %v1998_v48 = vpop.eup %1997 }
 0x639   :  { %v2000_v49 = vpop.eup %1999  ;;  %v1308_v50 = vadd.f32 1.0, %v1998_v48  ;;  %v2078_v48 = vmov 0.0  }
 0x63a   :  { %v1314_v51 = vadd.f32 1.0, %v2000_v49  ;;  %v2002_v52 = vpop.eup %2001  ;;  %v1910_v49 = vld [vmem:[%s2964_s4 + $0x8] sm:$0xff]  }
 0x63b   :  { %2005 = vrcp.f32 %v1308_v50  ;;  %v2004_v54 = vpop.eup %2003  ;;  %v1321_v15 = vadd.f32 1.0, %v2002_v52  ;;  %v1911_v50 = vld [vmem:[%s2964_s4 + $0x10] sm:$0xff]   ;;  %v1913_v52 = vld [vmem:[%s2964_s4 + $0x20] sm:$0xff]  }
 0x63c   :  { %2007 = vrcp.f32 %v1314_v51  ;;  %v1912_v51 = vld [vmem:[%s2964_s4 + $0x18] sm:$0xff]  }
 0x63d   :  { %2009 = vrcp.f32 %v1321_v15 }
 0x645   :  { %v2006_v55 = vpop.eup %2005 }
 0x646   :  { %v2008_v62 = vpop.eup %2007  ;;  %v1325_v13 = vmul.f32 %v2006_v55, %v2004_v54  ;;  %v1914_v54 = vld [vmem:[%s2964_s4 + $0x28] sm:$0xff]   ;;  %v1915_v55 = vld [vmem:[%s2964_s4 + $0x30] sm:$0xff]  }
 0x647   :  { %v1324_v17 = vmul.f32 %v2008_v62, %v2726_v44  ;;  %v2010_v18 = vpop.eup %2009  ;;  %v2071_v44 = vld [vmem:[%s2962_s2 + $0xc0] ss:$16 sps:$4 sm:$0xff]   ;;  %v1916_v62 = vld [vmem:[%s2964_s4 + $0x38] sm:$0xff]  }
 0x649   :  { %v2858_v16 = vadd.f32 %v1325_v13, %v1324_v17  ;;  %v3008_v17 = vld [vmem:[#allocation20_spill] sm:$0xff] }
 0x64b   :  { %2011 = vtanh.f32 %v2858_v16 }
 0x655   :  { %v2012_v1 = vpop.eup %2011 }
 0x656   :  { %v1328_v19 = vmul.f32 %v2012_v1, %v2010_v18  ;;  %v3009_v18 = vld [vmem:[#allocation21_spill] sm:$0xff] }
 0x658   :  { %v1333_v20 = vpack.c.bf16 %v1328_v19, %v1328_v19 }
 0x65a   :  { %1367 = vmatmul.mubr.bf16.vlgmr.msra.gmra.mrb[40].mxu0 %v1333_v20  ;;  %1408 = vmatmul.mubr.bf16.vlgmr.msra.gmra.mrb[40].mxu1 %v1333_v20 }
 0x65b   :  { %1450 = vmatpush1.bf16.msra.mxu0 %v2732_v53  ;;  %1491 = vmatpush1.bf16.msra.mxu1 %v2738_v28  ;;  %v2076_v53 = vld [vmem:[%s2962_s2 + $0xe8] ss:$16 sps:$4 sm:$0xff]  }
 0x65c   :  { %1451 = vmatprep.subr.bf16.mxu0 %v2744_v24  ;;  %1492 = vmatprep.subr.bf16.mxu1 %v2750_v10  ;;  %v3004_v10 = vld [vmem:[#allocation16_spill] sm:$0xff] }
 0x65d   :  { %1481 = vmatprep.mubr.bf16.mxu0 %v2990_v21  ;;  %1522 = vmatprep.mubr.bf16.mxu1 %v2990_v21  ;;  %v2065_v21 = vld [vmem:[%s2962_s2 + $0xa4] ss:$16 sps:$4 sm:$0xff]  }
 0x65f   :  { %1452 = vmatpush1.bf16.msra.mxu0 %v2758_v32  ;;  %1493 = vmatpush1.bf16.msra.mxu1 %v2764_v9  ;;  %v3005_v9 = vld [vmem:[#allocation17_spill] sm:$0xff] }
 0x660   :  { %1453 = vmatprep.subr.bf16.mxu0 %v2770_v12  ;;  %1494 = vmatprep.subr.bf16.mxu1 %v2776_v7 }
 0x663   :  { %1454 = vmatpush1.bf16.msra.mxu0 %v2782_v11  ;;  %1495 = vmatpush1.bf16.msra.mxu1 %v2788_v6  ;;  %v3006_v6 = vld [vmem:[#allocation18_spill] sm:$0xff] }
 0x664   :  { %1455 = vmatprep.subr.bf16.mxu0 %v2794_v22  ;;  %1496 = vmatprep.subr.bf16.mxu1 %v2800_v29  ;;  %v3007_v29 = vld [vmem:[#allocation19_spill] sm:$0xff] }
 0x667   :  { %1456 = vmatpush1.bf16.msra.mxu0 %v2806_v30  ;;  %1497 = vmatpush1.bf16.msra.mxu1 %v2812_v14 }
 0x668   :  { %1457 = vmatprep.subr.bf16.mxu0 %v2818_v38  ;;  %1498 = vmatprep.subr.bf16.mxu1 %v2824_v39 }
 0x66b   :  { %1458 = vmatpush1.bf16.msra.mxu0 %v2830_v40  ;;  %1499 = vmatpush1.bf16.msra.mxu1 %v2836_v41 }
 0x66c   :  { %1459 = vmatprep.subr.bf16.mxu0 %v2065_v21  ;;  %1500 = vmatprep.subr.bf16.mxu1 %v2066_v26  ;;  %v3010_v21 = vld [vmem:[#allocation22_spill] sm:$0xff] }
 0x66f   :  { %1460 = vmatpush1.bf16.msra.mxu0 %v2067_v8  ;;  %1501 = vmatpush1.bf16.msra.mxu1 %v2068_v23  ;;  %v3011_v8 = vld [vmem:[#allocation23_spill] sm:$0xff] }
 0x670   :  { %1461 = vmatprep.subr.bf16.mxu0 %v2069_v25  ;;  %1502 = vmatprep.subr.bf16.mxu1 %v2070_v27 }
 0x673   :  { %1462 = vmatpush1.bf16.msra.mxu0 %v2071_v44  ;;  %1503 = vmatpush1.bf16.msra.mxu1 %v2072_v33 }
 0x674   :  { %1463 = vmatprep.subr.bf16.mxu0 %v2073_v34  ;;  %1504 = vmatprep.subr.bf16.mxu1 %v2074_v31 }
 0x677   :  { %1464 = vmatpush1.bf16.msra.mxu0 %v2075_v35  ;;  %1505 = vmatpush1.bf16.msra.mxu1 %v2076_v53 }
 0x678   :  { %1786 = vmatprep.subr.bf16.mxu0 %v2078_v48 }
 0x72d   :  { %v1368_v28 = vpop.f32.mrb[40].mxu0  ;;  %v1409_v24 = vpop.f32.mrb[40].mxu1 }
 0x72e   :  { %v1416_v32 = vadd.f32 %v1368_v28, %v3004_v10  ;;  %v1418_v12 = vadd.f32 %v1409_v24, %v3005_v9  ;;  %v1370_v7 = vpop.f32.mrb[41].mxu0  ;;  %v1411_v11 = vpop.f32.mrb[41].mxu1 }
 0x72f   :  { %v1417_v22 = vadd.f32 %v1370_v7, %v3006_v6  ;;  %v1419_v30 = vadd.f32 %v1411_v11, %v3007_v29  ;;  %v1372_v14 = vpop.f32.mrb[42].mxu0  ;;  %v1413_v38 = vpop.f32.mrb[42].mxu1 }
 0x730   :  { %v1762_v39 = vmul.f32 -1.442695, %v1416_v32  ;;  %v1373_v40 = vpop.f32.mrb[43].mxu0  ;;  %v1414_v41 = vpop.f32.mrb[43].mxu1 }
 0x731   :  { %v1763_v56 = vmul.f32 -1.442695, %v1417_v22  ;;  %v1764_v57 = vmul.f32 -1.442695, %v1419_v30  ;;  %v1768_v40 = vld [vmem:[%s2965_s5] ss:$0 sm:$0xff] }
 0x732   :  { %2013 = vpow2.f32 %v1762_v39 }
 0x733   :  { %2015 = vpow2.f32 %v1763_v56 }
 0x734   :  { %2017 = vpow2.f32 %v1764_v57 }
 0x735   :  { %2019 = vtanh.f32 %v1418_v12 }
 0x73c   :  { %v2014_v58 = vpop.eup %2013 }
 0x73d   :  { %v2016_v59 = vpop.eup %2015  ;;  %v1423_v60 = vadd.f32 1.0, %v2014_v58 }
 0x73e   :  { %v1429_v61 = vadd.f32 1.0, %v2016_v59  ;;  %v2018_v63 = vpop.eup %2017 }
 0x73f   :  { %2021 = vrcp.f32 %v1423_v60  ;;  %v2020_v0 = vpop.eup %2019  ;;  %v1436_v3 = vadd.f32 1.0, %v2018_v63 }
 0x740   :  { %2023 = vrcp.f32 %v1429_v61 }
 0x741   :  { %2025 = vrcp.f32 %v1436_v3 }
 0x749   :  { %v2022_v42 = vpop.eup %2021 }
 0x74a   :  { %v2024_v2 = vpop.eup %2023  ;;  %v1440_v43 = vmul.f32 %v2022_v42, %v2020_v0 }
 0x74b   :  { %v1439_v45 = vmul.f32 %v2024_v2, %v2858_v16  ;;  %v2026_v46 = vpop.eup %2025 }
 0x74d   :  { %v2922_v4 = vadd.f32 %v1440_v43, %v1439_v45 }
 0x74f   :  { %2027 = vtanh.f32 %v2922_v4 }
 0x759   :  { %v2028_v5 = vpop.eup %2027 }
 0x75a   :  { %v1443_v47 = vmul.f32 %v2028_v5, %v2026_v46 }
 0x75c   :  { %v1448_v36 = vpack.c.bf16 %v1443_v47, %v1443_v47 }
 0x75e   :  { %1482 = vmatmul.mubr.bf16.vlgmr.msra.gmra.mrb[44].mxu0 %v1448_v36  ;;  %1523 = vmatmul.mubr.bf16.vlgmr.msra.gmra.mrb[44].mxu1 %v1448_v36 }
 0x75f   :  { %1787 = vmatpush3.bf16.msra.mxu0 %v1909_v37  ;;  %1802 = vmatprep.mubr.msk.bf16.mxu0 %vm2079_vm0, %v2078_v48 }
 0x760   :  { %1788 = vmatprep.subr.bf16.mxu0 %v2078_v48 }
 0x763   :  { %1789 = vmatpush3.bf16.msra.mxu0 %v1910_v49 }
 0x764   :  { %1790 = vmatprep.subr.bf16.mxu0 %v2078_v48 }
 0x767   :  { %1791 = vmatpush3.bf16.msra.mxu0 %v1911_v50 }
 0x768   :  { %1792 = vmatprep.subr.bf16.mxu0 %v2078_v48 }
 0x76b   :  { %1793 = vmatpush3.bf16.msra.mxu0 %v1912_v51 }
 0x76c   :  { %1794 = vmatprep.subr.bf16.mxu0 %v2078_v48 }
 0x76f   :  { %1795 = vmatpush3.bf16.msra.mxu0 %v1913_v52 }
 0x770   :  { %1796 = vmatprep.subr.bf16.mxu0 %v2078_v48 }
 0x773   :  { %1797 = vmatpush3.bf16.msra.mxu0 %v1914_v54 }
 0x774   :  { %1798 = vmatprep.subr.bf16.mxu0 %v2078_v48 }
 0x777   :  { %1799 = vmatpush3.bf16.msra.mxu0 %v1915_v55 }
 0x778   :  { %1800 = vmatprep.subr.bf16.mxu0 %v2078_v48 }
 0x77b   :  { %1801 = vmatpush3.bf16.msra.mxu0 %v1916_v62 }
 0x831   :  { %v1483_v13 = vpop.f32.mrb[44].mxu0  ;;  %v1524_v15 = vpop.f32.mrb[44].mxu1 }
 0x832   :  { %v1531_v16 = vadd.f32 %v1483_v13, %v3008_v17  ;;  %v1533_v1 = vadd.f32 %v1524_v15, %v3009_v18  ;;  %v1485_v19 = vpop.f32.mrb[45].mxu0  ;;  %v1526_v20 = vpop.f32.mrb[45].mxu1 }
 0x833   :  { %v1532_v26 = vadd.f32 %v1485_v19, %v3010_v21  ;;  %v1534_v23 = vadd.f32 %v1526_v20, %v3011_v8  ;;  %v1487_v25 = vpop.f32.mrb[46].mxu0  ;;  %v1528_v27 = vpop.f32.mrb[46].mxu1 }
 0x834   :  { %v1765_v44 = vmul.f32 -1.442695, %v1531_v16  ;;  %v1488_v33 = vpop.f32.mrb[47].mxu0  ;;  %v1529_v34 = vpop.f32.mrb[47].mxu1 }
 0x835   :  { %v1766_v31 = vmul.f32 -1.442695, %v1532_v26  ;;  %v1767_v35 = vmul.f32 -1.442695, %v1534_v23 }
 0x836   :  { %2029 = vpow2.f32 %v1765_v44 }
 0x837   :  { %2031 = vpow2.f32 %v1766_v31 }
 0x838   :  { %2033 = vpow2.f32 %v1767_v35 }
 0x839   :  { %2035 = vtanh.f32 %v1533_v1 }
 0x840   :  { %v2030_v53 = vpop.eup %2029 }
 0x841   :  { %v2032_v28 = vpop.eup %2031  ;;  %v1538_v24 = vadd.f32 1.0, %v2030_v53 }
 0x842   :  { %v1544_v10 = vadd.f32 1.0, %v2032_v28  ;;  %v2034_v32 = vpop.eup %2033 }
 0x843   :  { %2037 = vrcp.f32 %v1538_v24  ;;  %v2036_v9 = vpop.eup %2035  ;;  %v1551_v6 = vadd.f32 1.0, %v2034_v32 }
 0x844   :  { %2039 = vrcp.f32 %v1544_v10 }
 0x845   :  { %2041 = vrcp.f32 %v1551_v6 }
 0x84d   :  { %v2038_v12 = vpop.eup %2037 }
 0x84e   :  { %v2040_v7 = vpop.eup %2039  ;;  %v1555_v11 = vmul.f32 %v2038_v12, %v2036_v9 }
 0x84f   :  { %v1554_v22 = vmul.f32 %v2040_v7, %v2922_v4  ;;  %v2042_v30 = vpop.eup %2041 }
 0x851   :  { %v1556_v29 = vadd.f32 %v1555_v11, %v1554_v22 }
 0x853   :  { %2043 = vtanh.f32 %v1556_v29 }
 0x85d   :  { %v2044_v14 = vpop.eup %2043 }
 0x85e   :  { %v1558_v38 = vmul.f32 %v2044_v14, %v2042_v30 }
 0x860   :  { %v1559_v39 = vpack.c.bf16 %v1558_v38, %v1558_v38 }
 0x862   :  { %1803 = vmatmul.mubr.bf16.vlgmr.msra.gmra.mrb[48].mxu0 %v1559_v39 }
 0x935   :  { %v1665_v41 = vpop.f32.mrb[48].mxu0 }
 0x936   :  { %v1666_v56 = vadd.f32 %v1768_v40, %v1665_v41  ;;  %v1804_v57 = vpop.f32.mrb[49].mxu0 }
 0x937   :  { %v1668_v58 = vpop.f32.mrb[50].mxu0 }
 0x938   :  { %1671 = vst [vmem:[%s2966_s6] sm:$0xff] %v1666_v56  ;;  %v1805_v59 = vpop.f32.mrb[51].mxu0 }

</bundles_post_ra>
